<compile_context>
chip_gen: v5e
topology: v5e:2x2
jax: 0.10.0
libtpu: 0.0.40
codegen_flags: <defaults>
</compile_context>

<pallas_src>
import numpy as np
import jax
import jax.numpy as jnp
from jax import lax
from jax.experimental import pallas as pl
from jax.experimental.pallas import tpu as pltpu

IN_DIM = 6
OMEGA_FIRST = 30.0

# dot_general dimension numbers (same patterns as the Pallas TPU attention kernels)
_NT = (((1,), (1,)), ((), ()))   # contract lhs dim1 with rhs dim1  (rhs "transposed")
_TN = (((0,), (0,)), ((), ()))   # contract lhs dim0 with rhs dim0  (lhs "transposed")


def _siren_kernel(x_ref, w0_ref, b0_ref, w1_ref, b1_ref, w2_ref, b2_ref, o_ref):
    """One batch tile of the SIREN MLP.

    x_ref:  (Bt, 6)    batch-major input tile (as laid out in HBM)
    w0_ref: (H0, 6)    b0_ref: (H0, 1)   (omega=30 pre-folded into both)
    w1_ref: (H1, H0)   b1_ref: (H1, 1)
    w2_ref: (H1, P)    b2_ref: (1,  P)
    o_ref:  (Bt, P)    batch-major output tile

    Hidden activations are feature-major (features, Bt): the wide batch axis
    sits in lanes, so the sin() polynomials run lane-dense on the VPU.
    """
    x = x_ref[...]                                                # (Bt, 6)
    # Layer 0: 'hf,bf->hb'  -> (H0, Bt); omega folded into w0/b0.
    h = lax.dot_general(w0_ref[...], x, _NT,
                        preferred_element_type=jnp.float32)
    h = jnp.sin(h + b0_ref[...])
    # Layer 1: standard (H1, H0) @ (H0, Bt) -> (H1, Bt); omega = 1.
    h = jnp.dot(w1_ref[...], h, preferred_element_type=jnp.float32)
    h = jnp.sin(h + b1_ref[...])
    # Final projection emitted batch-major: 'hb,hp->bp' -> (Bt, P).
    out = lax.dot_general(h, w2_ref[...], _TN,
                          preferred_element_type=jnp.float32)
    o_ref[...] = (out + b2_ref[...]).astype(o_ref.dtype)


def prepare_kernel_params(params):
    """One-time prep: layer-0/1 weights to (out, in), biases to (out, 1),
    fold omega=30 into layer 0.  Final layer stays (in, out)/(1, out) so the
    kernel's TN contraction yields a batch-major output tile directly."""
    return {
        "w0": (OMEGA_FIRST * params["w0"]).T,          # (H0, 6)
        "b0": (OMEGA_FIRST * params["b0"]).T,          # (H0, 1)
        "w1": params["w1"].T,                          # (H1, H0)
        "b1": params["b1"].T,                          # (H1, 1)
        "w2": params["w2"],                            # (H1, P)   -- NOT transposed
        "b2": params["b2"],                            # (1,  P)
    }


def pose_embedder_siren(p, kparams, block_b=4096, out_dtype=jnp.float32):
    """p: (B, 6) float32, batch-major.  Returns (B, P) in out_dtype.

    block_b: batch-tile (lane) size; must be a multiple of 128.  4096-16384 is
    the sweet spot for large batches (per-tile VMEM ~0.43 KB/lane).  On v7x,
    keep block_b <= B/4 so both TensorCores get >= 2 grid steps each.
    """
    if block_b <= 0 or block_b % 128 != 0:
        raise ValueError("block_b must be a positive multiple of 128")
    B = p.shape[0]
    w0, b0 = kparams["w0"], kparams["b0"]
    w1, b1 = kparams["w1"], kparams["b1"]
    w2, b2 = kparams["w2"], kparams["b2"]
    h0, h1 = w0.shape[0], w1.shape[0]
    proj = w2.shape[1]

    # Cap the tile at the 128-rounded batch so small batches don't pay for a
    # huge padded tile; pad the batch (if needed) up to a multiple of the tile.
    bt = min(int(block_b), int(pl.cdiv(B, 128)) * 128)
    b_pad = int(pl.cdiv(B, bt)) * bt
    x = p.astype(jnp.float32)
    if b_pad != B:
        x = jnp.pad(x, ((0, b_pad - B), (0, 0)))

    grid = (b_pad // bt,)
    # Constant index_map -> parameters are DMA'd once and stay VMEM-resident.
    resident = lambda a: pl.BlockSpec(a.shape, lambda i: (0, 0))

    out_bytes = jnp.dtype(out_dtype).itemsize
    param_bytes = sum(int(np.prod(a.shape)) * 4 for a in (w0, b0, w1, b1, w2, b2))
    cost = pl.CostEstimate(
        flops=2 * (IN_DIM * h0 + h0 * h1 + h1 * proj) * b_pad,
        transcendentals=(h0 + h1) * b_pad,
        bytes_accessed=b_pad * (IN_DIM * 4 + proj * out_bytes) + param_bytes,
    )

    out = pl.pallas_call(
        _siren_kernel,
        out_shape=jax.ShapeDtypeStruct((b_pad, proj), out_dtype),
        grid=grid,
        in_specs=[
            pl.BlockSpec((bt, IN_DIM), lambda i: (i, 0)),   # streamed input tile
            resident(w0), resident(b0),
            resident(w1), resident(b1),
            resident(w2), resident(b2),
        ],
        out_specs=pl.BlockSpec((bt, proj), lambda i: (i, 0)),
        compiler_params=pltpu.CompilerParams(
            dimension_semantics=("parallel",),          # megacore split on v7x
            vmem_limit_bytes=32 * 1024 * 1024,          # covers v5e's 16 MiB default
        ),
        cost_estimate=cost,
    )(x, w0, b0, w1, b1, w2, b2)

    return out if b_pad == B else out[:B]


def init_params(key, hidden_counts, projection_size):
    """Deterministic init mimicking the PyTorch module's init scheme.
    Stored in (in, out) / (1, out) layout for the pure-JAX reference."""
    params = {}
    in_f = IN_DIM
    keys = jax.random.split(key, 2 * (len(hidden_counts) + 1))
    ki = 0
    for i, count in enumerate(hidden_counts):
        if i == 0:
            bound = 1.0 / in_f                       # first SIREN layer
        else:
            bound = np.sqrt(6.0 / in_f) / 1.0        # later layers, omega=1.0
        w = jax.random.uniform(keys[ki], (in_f, count), jnp.float32,
                               minval=-bound, maxval=bound)
        ki += 1
        params[f"w{i}"] = w
        params[f"b{i}"] = jnp.zeros((1, count), jnp.float32)   # nn.init.zeros_(bias)
        in_f = count
    # Final Linear: default PyTorch init U(-1/sqrt(in), 1/sqrt(in))
    bound = 1.0 / np.sqrt(in_f)
    idx = len(hidden_counts)
    params[f"w{idx}"] = jax.random.uniform(keys[ki], (in_f, projection_size),
                                           jnp.float32, minval=-bound, maxval=bound)
    ki += 1
    params[f"b{idx}"] = jax.random.uniform(keys[ki], (1, projection_size),
                                           jnp.float32, minval=-bound, maxval=bound)
    return params


def reference_forward(p, params):
    h = jnp.sin(OMEGA_FIRST * (p @ params["w0"] + params["b0"]))
    h = jnp.sin(h @ params["w1"] + params["b1"])
    return h @ params["w2"] + params["b2"]


if __name__ == "__main__":
    key = jax.random.PRNGKey(0)
    k_param, k_in = jax.random.split(key)

    hidden_counts = [32, 32]
    projection_size = 16
    batch = 300  # not a multiple of the tile -> exercises padding + multi-step grid

    params = init_params(k_param, hidden_counts, projection_size)
    kparams = prepare_kernel_params(params)
    p = jax.random.normal(k_in, (batch, IN_DIM), jnp.float32)

    # Small tile so the demo exercises padding + a 3-step grid.
    out_small = jax.block_until_ready(pose_embedder_siren(p, kparams, block_b=128))
    # Default (large-tile) path; bt is auto-capped to the 128-rounded batch.
    out_default = jax.block_until_ready(pose_embedder_siren(p, kparams))

    ref = reference_forward(p, params)
    np.testing.assert_allclose(np.asarray(out_small), np.asarray(ref),
                               rtol=1e-5, atol=1e-5)
    np.testing.assert_allclose(np.asarray(out_default), np.asarray(ref),
                               rtol=1e-5, atol=1e-5)
    print("KERNEL_OK")
</pallas_src>

<mosaic_0001>
module attributes {stable_mosaic.version = 11 : i64} {
  func.func @_siren_kernel(%arg0: i32, %arg1: memref<128x6xf32, #tpu.memory_space<vmem>>, %arg2: memref<32x6xf32, #tpu.memory_space<vmem>>, %arg3: memref<32x1xf32, #tpu.memory_space<vmem>>, %arg4: memref<32x32xf32, #tpu.memory_space<vmem>>, %arg5: memref<32x1xf32, #tpu.memory_space<vmem>>, %arg6: memref<32x16xf32, #tpu.memory_space<vmem>>, %arg7: memref<1x16xf32, #tpu.memory_space<vmem>>, %arg8: memref<128x16xf32, #tpu.memory_space<vmem>>) attributes {dimension_semantics = [#tpu.dimension_semantics<parallel>], iteration_bounds = array<i64: 3>, scalar_prefetch = 0 : i64, scratch_operands = 0 : i64, tpu.core_type = #tpu.core_type<tc>, window_params = [{transform_indices = @transform_0, window_bounds = array<i64: 128, 6>}, {pipeline_mode = #tpu.pipeline_mode<synchronous>, transform_indices = @transform_1, window_bounds = array<i64: 32, 6>}, {pipeline_mode = #tpu.pipeline_mode<synchronous>, transform_indices = @transform_2, window_bounds = array<i64: 32, 1>}, {pipeline_mode = #tpu.pipeline_mode<synchronous>, transform_indices = @transform_3, window_bounds = array<i64: 32, 32>}, {pipeline_mode = #tpu.pipeline_mode<synchronous>, transform_indices = @transform_4, window_bounds = array<i64: 32, 1>}, {pipeline_mode = #tpu.pipeline_mode<synchronous>, transform_indices = @transform_5, window_bounds = array<i64: 32, 16>}, {pipeline_mode = #tpu.pipeline_mode<synchronous>, transform_indices = @transform_6, window_bounds = array<i64: 1, 16>}, {transform_indices = @transform_7, window_bounds = array<i64: 128, 16>}]} {
    %c0 = arith.constant 0 : index
    %c0_0 = arith.constant 0 : index
    %0 = vector.load %arg1[%c0, %c0_0] : memref<128x6xf32, #tpu.memory_space<vmem>>, vector<128x6xf32>
    %c0_1 = arith.constant 0 : index
    %c0_2 = arith.constant 0 : index
    %1 = vector.load %arg2[%c0_1, %c0_2] : memref<32x6xf32, #tpu.memory_space<vmem>>, vector<32x6xf32>
    %cst = arith.constant dense<0.000000e+00> : vector<32x128xf32>
    %2 = tpu.matmul %1, %0, %cst {dimension_numbers = #tpu.dot_dimension_numbers<[1], [1], [0], [0], [0, 0, 1, 0], [], []>} : vector<32x6xf32>, vector<128x6xf32>, vector<32x128xf32> -> vector<32x128xf32>
    %c0_3 = arith.constant 0 : index
    %c0_4 = arith.constant 0 : index
    %3 = vector.load %arg3[%c0_3, %c0_4] : memref<32x1xf32, #tpu.memory_space<vmem>>, vector<32x1xf32>
    %4 = vector.broadcast %3 : vector<32x1xf32> to vector<32x128xf32>
    %5 = arith.addf %2, %4 : vector<32x128xf32>
    %6 = math.sin %5 : vector<32x128xf32>
    %c0_5 = arith.constant 0 : index
    %c0_6 = arith.constant 0 : index
    %7 = vector.load %arg4[%c0_5, %c0_6] : memref<32x32xf32, #tpu.memory_space<vmem>>, vector<32x32xf32>
    %cst_7 = arith.constant dense<0.000000e+00> : vector<32x128xf32>
    %8 = tpu.matmul %7, %6, %cst_7 {dimension_numbers = #tpu.dot_dimension_numbers<[1], [0], [0], [1], [0, 0, 1, 1], [], []>} : vector<32x32xf32>, vector<32x128xf32>, vector<32x128xf32> -> vector<32x128xf32>
    %c0_8 = arith.constant 0 : index
    %c0_9 = arith.constant 0 : index
    %9 = vector.load %arg5[%c0_8, %c0_9] : memref<32x1xf32, #tpu.memory_space<vmem>>, vector<32x1xf32>
    %10 = vector.broadcast %9 : vector<32x1xf32> to vector<32x128xf32>
    %11 = arith.addf %8, %10 : vector<32x128xf32>
    %12 = math.sin %11 : vector<32x128xf32>
    %c0_10 = arith.constant 0 : index
    %c0_11 = arith.constant 0 : index
    %13 = vector.load %arg6[%c0_10, %c0_11] : memref<32x16xf32, #tpu.memory_space<vmem>>, vector<32x16xf32>
    %cst_12 = arith.constant dense<0.000000e+00> : vector<128x16xf32>
    %14 = tpu.matmul %12, %13, %cst_12 {dimension_numbers = #tpu.dot_dimension_numbers<[0], [0], [1], [1], [0, 1, 1, 1], [], []>} : vector<32x128xf32>, vector<32x16xf32>, vector<128x16xf32> -> vector<128x16xf32>
    %c0_13 = arith.constant 0 : index
    %c0_14 = arith.constant 0 : index
    %15 = vector.load %arg7[%c0_13, %c0_14] : memref<1x16xf32, #tpu.memory_space<vmem>>, vector<1x16xf32>
    %16 = vector.broadcast %15 : vector<1x16xf32> to vector<128x16xf32>
    %17 = arith.addf %14, %16 : vector<128x16xf32>
    %c0_15 = arith.constant 0 : index
    %c0_16 = arith.constant 0 : index
    %18 = vector.load %arg8[%c0_15, %c0_16] : memref<128x16xf32, #tpu.memory_space<vmem>>, vector<128x16xf32>
    tpu.vector_store %arg8[%c0_15, %c0_16], %17 {strides = array<i32>} : memref<128x16xf32, #tpu.memory_space<vmem>>, vector<128x16xf32>,
    return
  }
  func.func @transform_0(%arg0: i32) -> (i32, i32) {
    %c0_i32 = arith.constant 0 : i32
    %c0_i32_0 = arith.constant 0 : i32
    return %arg0, %c0_i32 : i32, i32
  }
  func.func @transform_1(%arg0: i32) -> (i32, i32) {
    %c0_i32 = arith.constant 0 : i32
    %c0_i32_0 = arith.constant 0 : i32
    %c0_i32_1 = arith.constant 0 : i32
    return %c0_i32, %c0_i32_0 : i32, i32
  }
  func.func @transform_2(%arg0: i32) -> (i32, i32) {
    %c0_i32 = arith.constant 0 : i32
    %c0_i32_0 = arith.constant 0 : i32
    %c0_i32_1 = arith.constant 0 : i32
    return %c0_i32, %c0_i32_0 : i32, i32
  }
  func.func @transform_3(%arg0: i32) -> (i32, i32) {
    %c0_i32 = arith.constant 0 : i32
    %c0_i32_0 = arith.constant 0 : i32
    %c0_i32_1 = arith.constant 0 : i32
    return %c0_i32, %c0_i32_0 : i32, i32
  }
  func.func @transform_4(%arg0: i32) -> (i32, i32) {
    %c0_i32 = arith.constant 0 : i32
    %c0_i32_0 = arith.constant 0 : i32
    %c0_i32_1 = arith.constant 0 : i32
    return %c0_i32, %c0_i32_0 : i32, i32
  }
  func.func @transform_5(%arg0: i32) -> (i32, i32) {
    %c0_i32 = arith.constant 0 : i32
    %c0_i32_0 = arith.constant 0 : i32
    %c0_i32_1 = arith.constant 0 : i32
    return %c0_i32, %c0_i32_0 : i32, i32
  }
  func.func @transform_6(%arg0: i32) -> (i32, i32) {
    %c0_i32 = arith.constant 0 : i32
    %c0_i32_0 = arith.constant 0 : i32
    %c0_i32_1 = arith.constant 0 : i32
    return %c0_i32, %c0_i32_0 : i32, i32
  }
  func.func @transform_7(%arg0: i32) -> (i32, i32) {
    %c0_i32 = arith.constant 0 : i32
    %c0_i32_0 = arith.constant 0 : i32
    return %arg0, %c0_i32 : i32, i32
  }
}

</mosaic_0001>

<bundles_post_ra>
// kernel: tpu_custom_call.1
= control target key start
LH: loop header
LB: loop body
LE: loop exit
PB: predicated region body
PF: predicated region fallthrough
CT: control target
= control target key end

     0   :  { %s2106_s24 = smov 0   ;;  %s3323_s0 = inlined_call_operand.vmem [shape: f32[384,6], index: 0, kind: input, shape index: {}]   ;;  %s3324_s1 = inlined_call_operand.vmem [shape: f32[32,6], index: 1, kind: input, shape index: {}]   ;;  %s3325_s2 = inlined_call_operand.vmem [shape: f32[32,1], index: 2, kind: input, shape index: {}]   ;;  %s3326_s3 = inlined_call_operand.vmem [shape: f32[32,32], index: 3, kind: input, shape index: {}]   ;;  %s3327_s4 = inlined_call_operand.vmem [shape: f32[32,1], index: 4, kind: input, shape index: {}]   ;;  %s3328_s5 = inlined_call_operand.vmem [shape: f32[32,16], index: 5, kind: input, shape index: {}]   ;;  %s3329_s6 = inlined_call_operand.vmem [shape: f32[1,16], index: 6, kind: input, shape index: {}]   ;;  %s3330_s7 = inlined_call_operand.vmem [shape: f32[384,16], index: 7, kind: output, shape index: {}]  }
   0x1 LB: > { %s1952_s25 = sadd.s32 4294967295, %s2057_s24   ;;  %p1956_p0 = scmp.ge.s32.totalorder %s2057_s24, 1  ;;  %s2057_s24 = sphi %s2106_s24, %s17_s24  }
   0x2   : > { %p238_p1 = scmp.lt.s32.totalorder %s2057_s24, 4 }
   0x4   : > { %p239_p2 = pnand %p1956_p0, %p238_p1 }
   0x5   : > { %s1957_s26 = sshll.u32 (!%p239_p2), %s1952_s25, 4 }
   0x6   : > { %242 = sbr.rel (%p239_p2) target bundleno = 1101 (0x44d), region = 48  ;;  %p271_p3 = scmp.lt.s32.totalorder (!%p239_p2), %s1957_s26, 47 }
   0xb   : > { %s3368_s26 = smov (!%p271_p3, %s1957_s26), 47  ;;  %vm326_vm0 = vcmask 48128   ;;  %v303_v9 = vld [vmem:[%s3325_s2 + $0x8] sm:$0xff]  ;;  %v2059_v10 = vmov 0   ;;  %v302_v13 = vld [vmem:[%s3325_s2] sm:$0xff]  ;;  %v305_v14 = vld [vmem:[%s3325_s2 + $0x18] sm:$0xff] }
   0xc   : > { %s1958_s27 = sshll.u32 %s3368_s26, 3  ;;  %2048 = vset.pattern.permute.xlu1 %v2059_v10  ;;  %2047 = vset.pattern.permute.xlu0 %v2059_v10  ;;  %v304_v17 = vld [vmem:[%s3325_s2 + $0x10] sm:$0xff]  ;;  %v1043_v21 = vld [vmem:[%s3327_s4 + $0x18] sm:$0xff]  ;;  %v298_v23 = vld [vmem:[%s3324_s1] sm:$0xff] }
   0xd   : > { %s2122_s30 = scalar_lea.vmem %s3323_s0, %s1958_s27  ;;  %313 = vperm.xlu1 %2048, %v303_v9   ;;  %2049 = vset.pattern.permute.xlu2 %v2059_v10  ;;  %v1042_v20 = vld [vmem:[%s3327_s4 + $0x10] sm:$0xff]  ;;  %v299_v24 = vld [vmem:[%s3324_s1 + $0x8] sm:$0xff]  ;;  %v301_v26 = vld [vmem:[%s3324_s1 + $0x18] sm:$0xff]  ;;  %s3286_s12 = scalar_lea.vmem %s3330_s7, %s1958_s27 }
   0xe   : > { %v297_v0 = vld [vmem:[%s2122_s30 + $0x78] sm:$0xff]  ;;  %v296_v1 = vld [vmem:[%s2122_s30 + $0x70] sm:$0xff]  ;;  %v295_v2 = vld [vmem:[%s2122_s30 + $0x68] sm:$0xff]  ;;  %323 = vperm.xlu0 %2047, %v305_v14  }
   0xf   : > { %1961 = vmatpush.xpose.msk.msra.mxu0 %vm326_vm0, %v297_v0  ;;  %v294_v3 = vld [vmem:[%s2122_s30 + $0x60] sm:$0xff]  ;;  %v293_v4 = vld [vmem:[%s2122_s30 + $0x58] sm:$0xff]  ;;  %v292_v5 = vld [vmem:[%s2122_s30 + $0x50] sm:$0xff]  ;;  %v2060_v0 = vmov 2102212464  }
  0x10   : > { %v291_v6 = vld [vmem:[%s2122_s30 + $0x48] sm:$0xff]  ;;  %v290_v7 = vld [vmem:[%s2122_s30 + $0x40] sm:$0xff]  ;;  %v289_v8 = vld [vmem:[%s2122_s30 + $0x38] sm:$0xff] }
  0x11   : > { %v288_v11 = vld [vmem:[%s2122_s30 + $0x30] sm:$0xff]  ;;  %v287_v12 = vld [vmem:[%s2122_s30 + $0x28] sm:$0xff]  ;;  %v286_v15 = vld [vmem:[%s2122_s30 + $0x20] sm:$0xff] }
  0x12   : > { %v285_v16 = vld [vmem:[%s2122_s30 + $0x18] sm:$0xff]  ;;  %v284_v18 = vld [vmem:[%s2122_s30 + $0x10] sm:$0xff]  ;;  %v283_v19 = vld [vmem:[%s2122_s30 + $0x8] sm:$0xff] }
  0x13   : > { %1962 = vmatpush.xpose.msk.msra.mxu0 %vm326_vm0, %v296_v1  ;;  %v282_v22 = vld [vmem:[%s2122_s30] sm:$0xff]  ;;  %v300_v25 = vld [vmem:[%s3324_s1 + $0x10] sm:$0xff] }
  0x15   : > { %308 = vperm.xlu1 %2048, %v302_v13  }
  0x16   : > { %318 = vperm.xlu0 %2047, %v304_v17  }
  0x17   : > { %1963 = vmatpush.xpose.msk.msra.mxu0 %vm326_vm0, %v295_v2 }
  0x1b   : > { %1964 = vmatpush.xpose.msk.msra.mxu0 %vm326_vm0, %v294_v3 }
  0x1d   : > { %1061 = vperm.xlu1 %2048, %v1043_v21  }
  0x1e   : > { %1056 = vperm.xlu0 %2047, %v1042_v20  }
  0x1f   : > { %1965 = vmatpush.xpose.msk.msra.mxu0 %vm326_vm0, %v293_v4  ;;  %v3334_v4 = vmov 920167782  }
  0x23   : > { %1966 = vmatpush.xpose.msk.msra.mxu0 %vm326_vm0, %v292_v5 }
  0x27   : > { %1967 = vmatpush.xpose.msk.msra.mxu0 %vm326_vm0, %v291_v6 }
  0x2b   : > { %1968 = vmatpush.xpose.msk.msra.mxu0 %vm326_vm0, %v290_v7 }
  0x2f   : > { %1969 = vmatpush.xpose.msk.msra.mxu0 %vm326_vm0, %v289_v8 }
  0x33   : > { %1970 = vmatpush.xpose.msk.msra.mxu0 %vm326_vm0, %v288_v11 }
  0x37   : > { %1971 = vmatpush.xpose.msk.msra.mxu0 %vm326_vm0, %v287_v12 }
  0x3b   : > { %1972 = vmatpush.xpose.msk.msra.mxu0 %vm326_vm0, %v286_v15  ;;  %v2062_v15 = vmov 1326507024  }
  0x3f   : > { %1973 = vmatpush.xpose.msk.msra.mxu0 %vm326_vm0, %v285_v16 }
  0x43   : > { %1974 = vmatpush.xpose.msk.msra.mxu0 %vm326_vm0, %v284_v18  ;;  %v2063_v18 = vmov 683565275  }
  0x47   : > { %1975 = vmatpush.xpose.msk.msra.mxu0 %vm326_vm0, %v283_v19 }
  0x4b   : > { %1976 = vmatpush.xpose.msk.msra.mxu0 %vm326_vm0, %v282_v22 }
  0x4e   : > { %1977 = vmatmul.msk.f32.vlgmr.msra.gmra.mxu0 %vm326_vm0, %v298_v23  ;;  %v2064_v23 = vmov 2475754826  }
  0x56   : > { %1978 = vmatmul.msk.f32.gmra.mxu0 %vm326_vm0, %v299_v24 }
  0x5e   : > { %1979 = vmatmul.msk.f32.gmra.mxu0 %vm326_vm0, %v300_v25 }
  0x66   : > { %1980 = vmatmul.msk.f32.gmra.mxu0 %vm326_vm0, %v301_v26 }
  0x7f   : > { %v314_v27 = vpop.permute.xlu1 %313 }
  0x80   : > { %v324_v33 = vpop.permute.xlu0 %323 }
  0x87   : > { %v309_v28 = vpop.permute.xlu1 %308 }
  0x88   : > { %v319_v41 = vpop.permute.xlu0 %318 }
  0xcb   : > { %v404_v29 = vpop.f32.mrf.mxu0 }
  0xcc   : > { %v2193_v30 = vadd.f32 %v404_v29, %v309_v28 }
  0xce   : > { %v419_v31 = vand.u32 2139095040, %v2193_v30 }
  0xd0   : > { %v420_v32 = vshrl.u32 %v419_v31, 23 }
  0xd2   : > { %v1981_v34 = vadd.s32 4294967169, %v420_v32 }
  0xd3   : > { %v407_v35 = vpop.f32.mrf.mxu0 }
  0xd4   : > { %v2196_v36 = vadd.f32 %v407_v35, %v314_v27  ;;  %v426_v37 = vadd.s32 1, %v1981_v34 }
  0xd6   : > { %v574_v38 = vand.u32 2139095040, %v2196_v36  ;;  %vm427_vm1 = vcmp.gt.s32.totalorder %v426_v37, 0  ;;  %v3331_v47 = vand.u32 2147483647, %v2196_v36 }
  0xd7   : > { %v428_v44 = vsel %vm427_vm1, %v426_v37, 0 }
  0xd8   : > { %v575_v39 = vshrl.u32 %v574_v38, 23  ;;  %v2203_v48 = vand.u32 31, %v428_v44  ;;  %v2210_v55 = vand.u32 8388607, %v3331_v47  ;;  %v2226_v63 = vshrl.u32 %v428_v44, 5 }
  0xda   : > { %v1984_v40 = vadd.s32 4294967169, %v575_v39  ;;  %v2213_v56 = vsub.s32 32, %v2203_v48  ;;  %v2230_v1 = vshll.u32 %v2060_v0, %v2203_v48 }
  0xdb   : > { %v410_v42 = vpop.f32.mrf.mxu0 }
  0xdc   : > { %v2199_v43 = vadd.f32 %v410_v42, %v319_v41  ;;  %v581_v45 = vadd.s32 1, %v1984_v40  ;;  %v2235_v5 = vshrl.u32 %v3334_v4, %v2213_v56 }
  0xde   : > { %v729_v46 = vand.u32 2139095040, %v2199_v43  ;;  %vm582_vm2 = vcmp.gt.s32.totalorder %v581_v45, 0  ;;  %v3332_v51 = vand.u32 2147483647, %v2199_v43 }
  0xdf   : > { %v583_v49 = vsel %vm582_vm2, %v581_v45, 0 }
  0xe0   : > { %v730_v50 = vshrl.u32 %v729_v46, 23  ;;  %v2206_v52 = vand.u32 31, %v583_v49  ;;  %v2219_v59 = vand.u32 8388607, %v3332_v51  ;;  %v2237_v6 = vshrl.u32 %v583_v49, 5 }
  0xe2   : > { %v1987_v53 = vadd.s32 4294967169, %v730_v50  ;;  %v2222_v60 = vsub.s32 32, %v2206_v52  ;;  %v597_v9 = vshll.u32 %v2060_v0, %v2206_v52  ;;  %v2243_v11 = vshll.u32 %v3334_v4, %v2206_v52 }
  0xe3   : > { %v413_v54 = vpop.f32.mrf.mxu0  ;;  %v734_v13 = vor.u32 8388608, %v2219_v59  ;;  %v588_v19 = vshll.u32 %v2063_v18, %v2206_v52  ;;  %vm606_vm2 = vcmp.lt.s32.totalorder %v2237_v6, 4 }
  0xe4   : > { %v736_v57 = vadd.s32 1, %v1987_v53  ;;  %v2215_v58 = vadd.f32 %v413_v54, %v324_v33  ;;  %v598_v14 = vshrl.u32 %v3334_v4, %v2222_v60  ;;  %v2252_v16 = vshrl.u32 %v2062_v15, %v2222_v60 }
  0xe5   : > { %v589_v24 = vshrl.u32 %v2064_v23, %v2222_v60  ;;  %v2065_v33 = vmov 2131351028  }
  0xe6   : > { %vm737_vm3 = vcmp.gt.s32.totalorder %v736_v57, 0  ;;  %v884_v61 = vand.u32 2139095040, %v2215_v58  ;;  %v3333_v62 = vand.u32 2147483647, %v2215_v58  ;;  %v2272_v40 = vor.u32 %v598_v14, %v597_v9 }
  0xe7   : > { %v738_v2 = vsel %vm737_vm3, %v736_v57, 0  ;;  %v602_v41 = vor.u32 %v2252_v16, %v2243_v11  ;;  %v2281_v49 = vor.u32 %v589_v24, %v588_v19 }
  0xe8   : > { %v740_v7 = vand.u32 31, %v738_v2  ;;  %v885_v8 = vshrl.u32 %v884_v61, 23  ;;  %v888_v12 = vand.u32 8388607, %v3333_v62  ;;  %v2263_v29 = vshrl.u32 %v738_v2, 5 }
  0xea   : > { %v741_v17 = vsub.s32 32, %v740_v7  ;;  %v752_v20 = vshll.u32 %v2060_v0, %v740_v7  ;;  %v1990_v21 = vadd.s32 4294967169, %v885_v8  ;;  %v889_v22 = vor.u32 8388608, %v888_v12 }
  0xeb   : > { %v755_v26 = vshll.u32 %v3334_v4, %v740_v7  ;;  %v743_v32 = vshll.u32 %v2063_v18, %v740_v7  ;;  %v746_v39 = vshll.u32 %v2064_v23, %v740_v7  ;;  %vm761_vm5 = vcmp.lt.s32.totalorder %v2263_v29, 4 }
  0xec   : > { %v753_v25 = vshrl.u32 %v3334_v4, %v741_v17  ;;  %v756_v27 = vshrl.u32 %v2062_v15, %v741_v17  ;;  %v744_v28 = vshrl.u32 %v2064_v23, %v741_v17  ;;  %v891_v31 = vadd.s32 1, %v1990_v21 }
  0xed   : > { %v747_v34 = vshrl.u32 %v2065_v33, %v741_v17  ;;  %v2269_v38 = vshll.u32 %v889_v22, 8  ;;  %v750_v42 = vshrl.u32 %v2060_v0, %v741_v17  ;;  %v2285_v53 = vshrl.u32 %v2063_v18, %v741_v17 }
  0xee   : > { %v2267_v35 = vor.u32 %v753_v25, %v752_v20  ;;  %v757_v37 = vor.u32 %v756_v27, %v755_v26  ;;  %vm892_vm4 = vcmp.gt.s32.totalorder %v891_v31, 0  ;;  %v2277_v45 = vor.u32 %v744_v28, %v743_v32 }
  0xef   : > { %v893_v44 = vsel %vm892_vm4, %v891_v31, 0  ;;  %v2279_v46 = vor.u32 %v747_v34, %v746_v39  ;;  %v749_v54 = vshll.u32 %v2065_v33, %v740_v7  ;;  %v930_v2 = vand.u32 65535, %v2269_v38 }
  0xf0   : > { %v895_v50 = vand.u32 31, %v893_v44  ;;  %v767_v57 = vsel %vm761_vm5, %v2267_v35, 920167782  ;;  %v771_v61 = vsel %vm761_vm5, %v757_v37, 1326507024  ;;  %v931_v8 = vshrl.u32 %v2269_v38, 16 }
  0xf1   : > { %v894_v9 = vshrl.u32 %v893_v44, 5  ;;  %v751_v14 = vor.u32 %v750_v42, %v749_v54  ;;  %vm758_vm6 = vcmp.lt.s32.totalorder %v2263_v29, 1  ;;  %vm760_vm7 = vcmp.lt.s32.totalorder %v2263_v29, 3 }
  0xf2   : > { %v896_v12 = vsub.s32 32, %v895_v50  ;;  %v907_v17 = vshll.u32 %v2060_v0, %v895_v50  ;;  %v910_v7 = vshll.u32 %v3334_v4, %v895_v50  ;;  %v766_v19 = vsel %vm758_vm6, %v2277_v45, %v2279_v46 }
  0xf3   : > { %v898_v22 = vshll.u32 %v2063_v18, %v895_v50  ;;  %v901_v25 = vshll.u32 %v2064_v23, %v895_v50  ;;  %v904_v27 = vshll.u32 %v2065_v33, %v895_v50  ;;  %vm916_vm8 = vcmp.lt.s32.totalorder %v894_v9, 4 }
  0xf4   : > { %v908_v20 = vshrl.u32 %v3334_v4, %v896_v12  ;;  %v911_v21 = vshrl.u32 %v2062_v15, %v896_v12  ;;  %v899_v24 = vshrl.u32 %v2064_v23, %v896_v12  ;;  %v902_v26 = vshrl.u32 %v2065_v33, %v896_v12 }
  0xf5   : > { %v905_v28 = vshrl.u32 %v2060_v0, %v896_v12  ;;  %v897_v37 = vshrl.u32 %v2063_v18, %v896_v12  ;;  %vm913_vm9 = vcmp.lt.s32.totalorder %v894_v9, 1  ;;  %vm914_vm10 = vcmp.lt.s32.totalorder %v894_v9, 2 }
  0xf6   : > { %v909_v31 = vor.u32 %v908_v20, %v907_v17  ;;  %v912_v32 = vor.u32 %v911_v21, %v910_v7  ;;  %v900_v34 = vor.u32 %v899_v24, %v898_v22  ;;  %v903_v39 = vor.u32 %v902_v26, %v901_v25 }
  0xf7   : > { %v906_v42 = vor.u32 %v905_v28, %v904_v27  ;;  %vm915_vm11 = vcmp.lt.s32.totalorder %v894_v9, 3  ;;  %v768_v7 = vsel %vm760_vm7, %v751_v14, %v767_v57  ;;  %vm759_vm12 = vcmp.lt.s32.totalorder %v2263_v29, 2 }
  0xf8   : > { %v922_v44 = vsel %vm916_vm8, %v909_v31, 920167782  ;;  %v926_v54 = vsel %vm916_vm8, %v912_v32, 1326507024  ;;  %v921_v51 = vsel %vm913_vm9, %v900_v34, %v903_v39  ;;  %v917_v50 = vsel %vm913_vm9, %v897_v37, %v900_v34 }
  0xf9   : > { %v918_v47 = vsel %vm916_vm8, %v906_v42, 2102212464  ;;  %v923_v62 = vsel %vm915_vm11, %v906_v42, %v922_v44  ;;  %v925_v4 = vsel %vm913_vm9, %v903_v39, %v906_v42  ;;  %v927_v17 = vsel %vm915_vm11, %v909_v31, %v926_v54 }
  0xfa   : > { %v924_v3 = vsel %vm914_vm10, %v921_v51, %v923_v62  ;;  %v919_v20 = vsel %vm915_vm11, %v903_v39, %v918_v47  ;;  %v928_v12 = vsel %vm914_vm10, %v925_v4, %v927_v17  ;;  %v2319_v26 = vsel %vm761_vm5, %v751_v14, 2102212464 }
  0xfb   : > { %v954_v21 = vand.u32 65535, %v924_v3  ;;  %v955_v22 = vshrl.u32 %v924_v3, 16  ;;  %v932_v24 = vand.u32 65535, %v928_v12  ;;  %v933_v25 = vshrl.u32 %v928_v12, 16 }
  0xfc   : > { %v2323_v51 = vsel %vm759_vm12, %v766_v19, %v768_v7  ;;  %v770_v47 = vsel %vm758_vm6, %v2279_v46, %v751_v14  ;;  %v2329_v62 = vsel %vm914_vm10, %v917_v50, %v919_v20  ;;  %v772_v57 = vsel %vm760_vm7, %v2267_v35, %v771_v61 }
  0xfd   : > { %v957_v27 = vmul.u32 %v955_v22, %v930_v2  ;;  %v958_v28 = vmul.u32 %v954_v21, %v931_v8  ;;  %v935_v3 = vmul.u32 %v933_v25, %v930_v2  ;;  %v936_v4 = vmul.u32 %v932_v24, %v931_v8 }
  0xfe   : > { %v934_v31 = vmul.u32 %v932_v24, %v930_v2  ;;  %v956_v32 = vmul.u32 %v954_v21, %v930_v2  ;;  %v959_v34 = vmul.u32 %v955_v22, %v931_v8  ;;  %v937_v39 = vmul.u32 %v933_v25, %v931_v8 }
  0xff   : > { %v960_v37 = vshll.u32 %v957_v27, 16  ;;  %v938_v19 = vshll.u32 %v935_v3, 16  ;;  %v961_v42 = vshrl.u32 %v957_v27, 16  ;;  %v962_v44 = vshll.u32 %v958_v28, 16 }
 0x100   : > { %v773_v9 = vsel %vm759_vm12, %v770_v47, %v772_v57  ;;  %v2338_v14 = vshll.u32 %v734_v13, 8  ;;  %v940_v50 = vshll.u32 %v936_v4, 16  ;;  %v939_v24 = vshrl.u32 %v935_v3, 16 }
 0x101   : > { %vm964_vm13 = vc.u32 %v956_v32, %v960_v37  ;;  %v966_v54 = vadd.s32 %v960_v37, %v956_v32  ;;  %vm942_vm14 = vc.u32 %v934_v31, %v938_v19  ;;  %v944_v35 = vadd.s32 %v938_v19, %v934_v31 }
 0x102   : > { %v965_v61 = vsel %vm964_vm13, 1, %v2059_v10  ;;  %v943_v2 = vsel %vm942_vm14, 1, %v2059_v10  ;;  %v777_v17 = vand.u32 65535, %v773_v9  ;;  %v775_v12 = vand.u32 65535, %v2338_v14 }
 0x103   : > { %v967_v8 = vadd.s32 %v965_v61, %v959_v34  ;;  %vm968_vm15 = vc.u32 %v966_v54, %v962_v44  ;;  %v945_v7 = vadd.s32 %v943_v2, %v937_v39  ;;  %vm946_vm0 = vc.u32 %v944_v35, %v940_v50 }
 0x104   : > { %v969_v20 = vsel %vm968_vm15, 1, %v2059_v10  ;;  %v947_v59 = vsel %vm946_vm0, 1, %v2059_v10  ;;  %v776_v21 = vshrl.u32 %v2338_v14, 16  ;;  %v778_v22 = vshrl.u32 %v773_v9, 16 }
 0x105   : > { %v971_v13 = vadd.s32 %v969_v20, %v967_v8  ;;  %v949_v25 = vadd.s32 %v947_v59, %v945_v7  ;;  %v799_v27 = vand.u32 65535, %v2323_v51  ;;  %v800_v47 = vshrl.u32 %v2323_v51, 16 }
 0x106   : > { %v963_v57 = vshrl.u32 %v958_v28, 16  ;;  %v780_v32 = vmul.u32 %v778_v22, %v775_v12  ;;  %v781_v34 = vmul.u32 %v777_v17, %v776_v21  ;;  %v941_v37 = vshrl.u32 %v936_v4, 16 }
 0x107   : > { %v972_v31 = vadd.s32 %v971_v13, %v961_v42  ;;  %v950_v39 = vadd.s32 %v949_v25, %v939_v24  ;;  %v974_v19 = vmul.u32 %v2269_v38, %v2329_v62  ;;  %v802_v50 = vmul.u32 %v800_v47, %v775_v12 }
 0x108   : > { %v779_v61 = vmul.u32 %v777_v17, %v775_v12  ;;  %v783_v2 = vshll.u32 %v780_v32, 16  ;;  %v803_v9 = vmul.u32 %v799_v27, %v776_v21  ;;  %v2352_v8 = vadd.s32 %v966_v54, %v962_v44 }
 0x109   : > { %v973_v35 = vadd.s32 %v972_v31, %v963_v57  ;;  %v2350_v3 = vadd.s32 %v950_v39, %v941_v37  ;;  %v782_v7 = vmul.u32 %v778_v22, %v776_v21  ;;  %v805_v51 = vshll.u32 %v802_v50, 16 }
 0x10a   : > { %v785_v42 = vshll.u32 %v781_v34, 16  ;;  %vm787_vm1 = vc.u32 %v779_v61, %v783_v2  ;;  %v789_v20 = vadd.s32 %v783_v2, %v779_v61  ;;  %v801_v62 = vmul.u32 %v799_v27, %v775_v12 }
 0x10b   : > { %v977_v28 = vadd.s32 1, %v973_v35  ;;  %vm976_vm3 = vc.u32 %v2350_v3, %v2352_v8  ;;  %v788_v38 = vsel %vm787_vm1, 1, %v2059_v10  ;;  %v804_v4 = vmul.u32 %v800_v47, %v776_v21 }
 0x10c   : > { %v790_v59 = vadd.s32 %v788_v38, %v782_v7  ;;  %vm791_vm4 = vc.u32 %v789_v20, %v785_v42  ;;  %v807_v44 = vshll.u32 %v803_v9, 16  ;;  %vm809_vm5 = vc.u32 %v801_v62, %v805_v51 }
 0x10d   : > { %v978_v17 = vsel %vm976_vm3, %v977_v28, %v973_v35  ;;  %v792_v13 = vsel %vm791_vm4, 1, %v2059_v10  ;;  %v811_v22 = vadd.s32 %v805_v51, %v801_v62  ;;  %v784_v24 = vshrl.u32 %v780_v32, 16 }
 0x10e   : > { %v979_v54 = vadd.s32 %v978_v17, %v974_v19  ;;  %v786_v25 = vshrl.u32 %v781_v34, 16  ;;  %v794_v57 = vadd.s32 %v792_v13, %v790_v59  ;;  %v810_v31 = vsel %vm809_vm5, 1, %v2059_v10 }
 0x10f   : > { %v806_v39 = vshrl.u32 %v802_v50, 16  ;;  %v812_v61 = vadd.s32 %v810_v31, %v804_v4  ;;  %vm813_vm8 = vc.u32 %v811_v22, %v807_v44  ;;  %v591_v27 = vshll.u32 %v2064_v23, %v2206_v52 }
 0x110   : > { %v980_v37 = vadd.s32 536870912, %v979_v54  ;;  %v795_v12 = vadd.s32 %v794_v57, %v784_v24  ;;  %v814_v21 = vsel %vm813_vm8, 1, %v2059_v10  ;;  %v592_v47 = vshrl.u32 %v2065_v33, %v2222_v60 }
 0x111   : > { %v816_v32 = vadd.s32 %v814_v21, %v812_v61  ;;  %v594_v34 = vshll.u32 %v2065_v33, %v2206_v52  ;;  %v595_v50 = vshrl.u32 %v2060_v0, %v2222_v60  ;;  %v762_v35 = vsel %vm758_vm6, %v2285_v53, %v2277_v45 }
 0x112   : > { %v2365_v19 = vshrl.u32 %v980_v37, 30  ;;  %v764_v2 = vsel %vm760_vm7, %v2279_v46, %v2319_v26  ;;  %v796_v7 = vadd.s32 %v795_v12, %v786_v25  ;;  %v2379_v51 = vor.u32 %v592_v47, %v591_v27 }
 0x113   : > { %v808_v42 = vshrl.u32 %v803_v9, 16  ;;  %v817_v52 = vadd.s32 %v816_v32, %v806_v39  ;;  %v2382_v20 = vor.u32 %v595_v50, %v594_v34  ;;  %v2386_v38 = vshrl.u32 %v2062_v15, %v2213_v56 }
 0x114   : > { %v982_v28 = vshll.u32 %v2365_v19, 30  ;;  %v612_v45 = vsel %vm606_vm2, %v2272_v40, 920167782  ;;  %v616_v46 = vsel %vm606_vm2, %v602_v41, 1326507024  ;;  %v815_v53 = vadd.s32 %v811_v22, %v807_v44 }
 0x115   : > { %v765_v9 = vsel %vm759_vm12, %v762_v35, %v764_v2  ;;  %v818_v62 = vadd.s32 %v817_v52, %v808_v42  ;;  %vm603_vm6 = vcmp.lt.s32.totalorder %v2237_v6, 1  ;;  %vm605_vm9 = vcmp.lt.s32.totalorder %v2237_v6, 3 }
 0x116   : > { %v983_v26 = vsub.s32 %v979_v54, %v982_v28  ;;  %vm821_vm7 = vc.u32 %v796_v7, %v815_v53  ;;  %v611_v4 = vsel %vm603_vm6, %v2281_v49, %v2379_v51  ;;  %v615_v11 = vsel %vm603_vm6, %v2379_v51, %v2382_v20 }
 0x117   : > { %v822_v29 = vadd.s32 1, %v818_v62  ;;  %v613_v41 = vsel %vm605_vm9, %v2382_v20, %v612_v45  ;;  %v819_v17 = vmul.u32 %v2338_v14, %v765_v9  ;;  %vm604_vm11 = vcmp.lt.s32.totalorder %v2237_v6, 2 }
 0x118   : > { %vm984_vm10 = vcmp.lt.s32.totalorder %v983_v26, 0  ;;  %v985_v16 = vsub.s32 0, %v983_v26  ;;  %v617_v59 = vsel %vm605_vm9, %v2272_v40, %v616_v46  ;;  %v3340_v44 = vor.u32 8388608, %v2210_v55 }
 0x119   : > { %v3341_v13 = vmov 920167782   ;;  %v823_v25 = vsel %vm821_vm7, %v822_v29, %v818_v62  ;;  %v618_v57 = vsel %vm604_vm11, %v615_v11, %v617_v59  ;;  %v2428_v14 = vor.u32 %v2235_v5, %v2230_v1 }
 0x11a   : > { %v2418_v54 = vshll.u32 %v3340_v44, 8  ;;  %v2422_v22 = vshll.u32 %v3341_v13, %v2203_v48  ;;  %v986_v24 = vsel %vm984_vm10, %v985_v16, %v983_v26  ;;  %v824_v37 = vadd.s32 %v823_v25, %v819_v17 }
 0x11b   : > { %v987_v31 = vclz %v986_v24  ;;  %v2432_v55 = vsel %vm604_vm11, %v611_v4, %v613_v41  ;;  %vm883_vm12 = vcmp.lt.s32.totalorder %v2215_v58, 0  ;;  %v587_v39 = vshrl.u32 %v2063_v18, %v2222_v60 }
 0x11c   : > { %v447_v40 = vor.u32 %v2386_v38, %v2422_v22  ;;  %v622_v61 = vand.u32 65535, %v618_v57  ;;  %v825_v21 = vadd.s32 536870912, %v824_v37  ;;  %v620_v1 = vand.u32 65535, %v2418_v54 }
 0x11d   : > { %v1991_v12 = vadd.s32 4294967294, %v987_v31  ;;  %v623_v5 = vshrl.u32 %v618_v57, 16  ;;  %v3342_v27 = vand.u32 2147483647, %v2215_v58  ;;  %v1005_v32 = vsub.s32 4, %v2365_v19 }
 0x11e   : > { %v621_v34 = vshrl.u32 %v2418_v54, 16  ;;  %v645_v50 = vshrl.u32 %v2432_v55, 16  ;;  %v975_v60 = vadd.s32 %v2352_v8, %v2350_v3  ;;  %v2451_v35 = vshrl.u32 %v825_v21, 30 }
 0x11f   : > { %vm2442_vm13 = vcmp.le.f32.partialorder %v3342_v27, 0.7853982  ;;  %vm1992_vm14 = vcmp.lt.s32.totalorder %v1991_v12, 0  ;;  %v625_v2 = vmul.u32 %v623_v5, %v620_v1  ;;  %v2453_v42 = vadd.s32 %v815_v53, %v796_v7 }
 0x120   : > { %v990_v28 = vsel %vm1992_vm14, 0, %v1991_v12  ;;  %v2455_v52 = vmul.u32 %v622_v61, %v621_v34  ;;  %v644_v45 = vand.u32 65535, %v2432_v55  ;;  %v827_v62 = vshll.u32 %v2451_v35, 30 }
 0x121   : > { %v991_v46 = vsub.s32 32, %v990_v28  ;;  %v995_v9 = vsub.s32 4294967266, %v990_v28  ;;  %v2462_v4 = vsel %vm603_vm6, %v587_v39, %v2281_v49  ;;  %v1006_v3 = vsel %vm883_vm12, %v1005_v32, %v2365_v19 }
 0x122   : > { %v624_v8 = vmul.u32 %v622_v61, %v620_v1  ;;  %v628_v7 = vshll.u32 %v625_v2, 16  ;;  %v647_v53 = vmul.u32 %v645_v50, %v620_v1  ;;  %v992_v11 = vshll.u32 %v983_v26, %v990_v28 }
 0x123   : > { %v993_v16 = vshrl.u32 %v975_v60, %v991_v46  ;;  %v996_v29 = vadd.s32 127, %v995_v9  ;;  %v828_v41 = vsub.s32 %v824_v37, %v827_v62  ;;  %v630_v17 = vshll.u32 %v2455_v52, 16 }
 0x124   : > { %vm632_vm15 = vc.u32 %v624_v8, %v628_v7  ;;  %v634_v59 = vadd.s32 %v628_v7, %v624_v8  ;;  %v648_v44 = vmul.u32 %v644_v45, %v621_v34  ;;  %v627_v57 = vmul.u32 %v623_v5, %v621_v34 }
 0x125   : > { %v994_v24 = vor.u32 %v993_v16, %v992_v11  ;;  %v997_v25 = vshll.u32 %v996_v29, 23  ;;  %vm829_vm0 = vcmp.lt.s32.totalorder %v828_v41, 0  ;;  %v830_v49 = vsub.s32 0, %v828_v41 }
 0x126   : > { %v633_v31 = vsel %vm632_vm15, 1, %v2059_v10  ;;  %vm636_vm1 = vc.u32 %v634_v59, %v630_v17  ;;  %v650_v19 = vshll.u32 %v647_v53, 16  ;;  %v1008_v26 = vsel %vm2442_vm13, 0, %v1006_v3 }
 0x127   : > { %v998_v55 = vor.u32 4788187, %v997_v25  ;;  %v831_v39 = vsel %vm829_vm0, %v830_v49, %v828_v41  ;;  %v608_v37 = vsel %vm606_vm2, %v2382_v20, 2102212464  ;;  %v635_v12 = vadd.s32 %v633_v31, %v627_v57 }
 0x128   : > { %v832_v61 = vclz %v831_v39  ;;  %v637_v21 = vsel %vm636_vm1, 1, %v2059_v10  ;;  %v646_v27 = vmul.u32 %v644_v45, %v620_v1  ;;  %v1001_v5 = vcvt.s32.f32 %v994_v24 }
 0x129   : > { %v999_v32 = vand.u32 2147483647, %v998_v55  ;;  %v629_v60 = vshrl.u32 %v625_v2, 16  ;;  %v652_v28 = vshll.u32 %v648_v44, 16  ;;  %v639_v9 = vadd.s32 %v637_v21, %v635_v12 }
 0x12a   : > { %v1988_v46 = vadd.s32 4294967294, %v832_v61  ;;  %vm654_vm3 = vc.u32 %v646_v27, %v650_v19  ;;  %v656_v62 = vadd.s32 %v650_v19, %v646_v27  ;;  %v1025_v3 = vadd.s32 3, %v1008_v26 }
 0x12b   : > { %v1002_v8 = vmul.f32 %v1001_v5, %v999_v32  ;;  %v609_v7 = vsel %vm605_vm9, %v2379_v51, %v608_v37  ;;  %v649_v20 = vmul.u32 %v645_v50, %v621_v34  ;;  %v640_v11 = vadd.s32 %v639_v9, %v629_v60 }
 0x12c   : > { %vm1989_vm2 = vcmp.lt.s32.totalorder %v1988_v46, 0  ;;  %v655_v16 = vsel %vm654_vm3, 1, %v2059_v10  ;;  %vm658_vm4 = vc.u32 %v656_v62, %v652_v28  ;;  %vm451_vm5 = vcmp.lt.s32.totalorder %v2226_v63, 4 }
 0x12d   : > { %v1003_v1 = vxor.u32 2147483648, %v1002_v8  ;;  %v835_v45 = vsel %vm1989_vm2, 0, %v1988_v46  ;;  %v657_v2 = vadd.s32 %v655_v16, %v649_v20  ;;  %v659_v29 = vsel %vm658_vm4, 1, %v2059_v10 }
 0x12e   : > { %v836_v17 = vsub.s32 32, %v835_v45  ;;  %v840_v59 = vsub.s32 4294967266, %v835_v45  ;;  %v850_v24 = vsub.s32 4, %v2451_v35  ;;  %v631_v25 = vshrl.u32 %v2455_v52, 16 }
 0x12f   : > { %v1004_v51 = vsel %vm883_vm12, %v1003_v1, %v1002_v8  ;;  %v837_v34 = vshll.u32 %v828_v41, %v835_v45  ;;  %v651_v50 = vshrl.u32 %v647_v53, 16  ;;  %v661_v49 = vadd.s32 %v659_v29, %v657_v2 }
 0x130   : > { %v2488_v57 = vsel %vm2442_vm13, %v2215_v58, %v1004_v51  ;;  %v838_v31 = vshrl.u32 %v2453_v42, %v836_v17  ;;  %v841_v19 = vadd.s32 127, %v840_v59  ;;  %v2491_v55 = vadd.s32 %v640_v11, %v631_v25 }
 0x131   : > { %v1009_v26 = vmul.f32 %v2488_v57, %v2488_v57  ;;  %vm728_vm8 = vcmp.lt.s32.totalorder %v2199_v43, 0  ;;  %v653_v52 = vshrl.u32 %v648_v44, 16  ;;  %v662_v39 = vadd.s32 %v661_v49, %v651_v50 }
 0x132   : > { %v839_v41 = vor.u32 %v838_v31, %v837_v34  ;;  %v842_v53 = vshll.u32 %v841_v19, 23  ;;  %v610_v47 = vsel %vm604_vm11, %v2462_v4, %v609_v7  ;;  %v2499_v37 = vadd.s32 %v656_v62, %v652_v28 }
 0x133   : > { %v1010_v61 = vmul.f32 -0.001358992, %v1009_v26  ;;  %v1017_v42 = vmul.f32 -0.00019511016, %v1009_v26  ;;  %v851_v12 = vsel %vm728_vm8, %v850_v24, %v2451_v35  ;;  %v663_v21 = vadd.s32 %v662_v39, %v653_v52 }
 0x134   : > { %v2504_v27 = vand.u32 3, %v1025_v3  ;;  %v3345_v44 = vand.u32 2147483647, %v2199_v43  ;;  %v843_v5 = vor.u32 4788187, %v842_v53  ;;  %vm666_vm7 = vc.u32 %v2491_v55, %v2499_v37 }
 0x135   : > { %v1011_v6 = vadd.f32 0.041655596, %v1010_v61  ;;  %v1018_v4 = vadd.f32 0.008332121, %v1017_v42  ;;  %v664_v60 = vmul.u32 %v2418_v54, %v610_v47  ;;  %v667_v28 = vadd.s32 1, %v663_v21 }
 0x136   : > { %vm2508_vm6 = vcmp.le.f32.partialorder %v3345_v44, 0.7853982  ;;  %v844_v46 = vand.u32 2147483647, %v843_v5  ;;  %v846_v35 = vcvt.s32.f32 %v839_v41  ;;  %v416_v62 = vand.u32 2147483647, %v2193_v30 }
 0x137   : > { %v853_v9 = vsel %vm2508_vm6, 0, %v851_v12  ;;  %v457_v8 = vsel %vm451_vm5, %v2428_v14, 920167782  ;;  %v1012_v3 = vmul.f32 %v1011_v6, %v1009_v26  ;;  %v1019_v7 = vmul.f32 %v1018_v4, %v1009_v26 }
 0x138   : > { %v668_v20 = vsel %vm666_vm7, %v667_v28, %v663_v21  ;;  %v461_v54 = vsel %vm451_vm5, %v447_v40, 1326507024  ;;  %v847_v11 = vmul.f32 %v846_v35, %v844_v46  ;;  %v434_v1 = vshrl.u32 %v2064_v23, %v2213_v56 }
 0x139   : > { %v669_v16 = vadd.s32 %v668_v20, %v664_v60  ;;  %v1013_v45 = vadd.f32 -0.4999988, %v1012_v3  ;;  %v1020_v2 = vadd.f32 -0.16666654, %v1019_v7  ;;  %v870_v29 = vadd.s32 3, %v853_v9 }
 0x13a   : > { %v437_v17 = vshrl.u32 %v2065_v33, %v2213_v56  ;;  %vm1028_vm9 = vcmp.eq.s32.totalorder %v2504_v27, 0  ;;  %vm1031_vm10 = vcmp.eq.s32.totalorder %v2504_v27, 2  ;;  %v848_v59 = vxor.u32 2147483648, %v847_v11 }
 0x13b   : > { %v670_v38 = vadd.s32 536870912, %v669_v16  ;;  %v423_v22 = vand.u32 8388607, %v416_v62  ;;  %v433_v40 = vshll.u32 %v2063_v18, %v2203_v48  ;;  %v1014_v24 = vmul.f32 %v1013_v45, %v1009_v26 }
 0x13c   : > { %v1021_v25 = vmul.f32 %v1020_v2, %v1009_v26  ;;  %vm1027_vm11 = vcmp.lt.s32.totalorder %v2504_v27, 2  ;;  %v436_v51 = vshll.u32 %v2064_v23, %v2203_v48  ;;  %v440_v34 = vshrl.u32 %v2060_v0, %v2213_v56 }
 0x13d   : > { %vm1024_vm12 = vweird.f32 %v2215_v58  ;;  %v849_v50 = vsel %vm728_vm8, %v848_v59, %v847_v11  ;;  %v2544_v49 = vshrl.u32 %v670_v38, 30  ;;  %v2546_v31 = vor.u32 %v434_v1, %v433_v40 }
 0x13e   : > { %v439_v19 = vshll.u32 %v2065_v33, %v2203_v48  ;;  %v1015_v26 = vadd.f32 1.0, %v1014_v24  ;;  %v1022_v52 = vadd.f32 1.0, %v1021_v25  ;;  %v852_v39 = vsel %vm2508_vm6, %v2199_v43, %v849_v50 }
 0x13f   : > { %v2553_v41 = vor.u32 %v437_v17, %v436_v51  ;;  %v854_v53 = vmul.f32 %v852_v39, %v852_v39  ;;  %v2555_v47 = vand.u32 3, %v870_v29  ;;  %v672_v61 = vshll.u32 %v2544_v49, 30 }
 0x140   : > { %v424_v42 = vor.u32 8388608, %v423_v22  ;;  %v1023_v12 = vmul.f32 %v1022_v52, %v2488_v57  ;;  %v1032_v21 = vxor.u32 2147483648, %v1015_v26  ;;  %v2559_v44 = vor.u32 %v440_v34, %v439_v19 }
 0x141   : > { %vm448_vm13 = vcmp.lt.s32.totalorder %v2226_v63, 1  ;;  %v855_v48 = vmul.f32 -0.001358992, %v854_v53  ;;  %v862_v5 = vmul.f32 -0.00019511016, %v854_v53  ;;  %v673_v6 = vsub.s32 %v669_v16, %v672_v61 }
 0x142   : > { %vm450_vm14 = vcmp.lt.s32.totalorder %v2226_v63, 3  ;;  %v1029_v32 = vxor.u32 2147483648, %v1023_v12  ;;  %vm449_vm15 = vcmp.lt.s32.totalorder %v2226_v63, 2  ;;  %v456_v4 = vsel %vm448_vm13, %v2546_v31, %v2553_v41 }
 0x143   : > { %v462_v57 = vsel %vm450_vm14, %v2428_v14, %v461_v54  ;;  %v856_v60 = vadd.f32 0.041655596, %v855_v48  ;;  %v863_v28 = vadd.f32 0.008332121, %v862_v5  ;;  %vm674_vm0 = vcmp.lt.s32.totalorder %v673_v6, 0 }
 0x144   : > { %v675_v46 = vsub.s32 0, %v673_v6  ;;  %v1030_v35 = vsel %vm1028_vm9, %v1015_v26, %v1029_v32  ;;  %v1033_v9 = vsel %vm1031_vm10, %v1032_v21, %v1023_v12  ;;  %v458_v3 = vsel %vm450_vm14, %v2559_v44, %v457_v8 }
 0x145   : > { %v460_v7 = vsel %vm448_vm13, %v2553_v41, %v2559_v44  ;;  %v1034_v14 = vsel %vm1027_vm11, %v1030_v35, %v1033_v9  ;;  %v857_v20 = vmul.f32 %v856_v60, %v854_v53  ;;  %v864_v54 = vmul.f32 %v863_v28, %v854_v53 }
 0x146   : > { %v676_v11 = vsel %vm674_vm0, %v675_v46, %v673_v6  ;;  %v1035_v16 = vsel %vm1024_vm12, nan, %v1034_v14  ;;  %v463_v45 = vsel %vm449_vm15, %v460_v7, %v462_v57  ;;  %v2588_v2 = vshll.u32 %v424_v42, 8 }
 0x147   : > { %v677_v1 = vclz %v676_v11  ;;  %1089 = vmatpush.msra.mxu1 %v1035_v16  ;;  %v858_v8 = vadd.f32 -0.4999988, %v857_v20  ;;  %v865_v29 = vadd.f32 -0.16666654, %v864_v54  ;;  %vm873_vm1 = vcmp.eq.s32.totalorder %v2555_v47, 0 }
 0x148   : > { %v459_v27 = vsel %vm449_vm15, %v456_v4, %v458_v3  ;;  %vm872_vm3 = vcmp.lt.s32.totalorder %v2555_v47, 2  ;;  %v467_v58 = vand.u32 65535, %v463_v45  ;;  %v468_v22 = vshrl.u32 %v463_v45, 16 }
 0x149   : > { %v1985_v17 = vadd.s32 4294967294, %v677_v1  ;;  %v859_v59 = vmul.f32 %v858_v8, %v854_v53  ;;  %v866_v38 = vmul.f32 %v865_v29, %v854_v53  ;;  %vm876_vm2 = vcmp.eq.s32.totalorder %v2555_v47, 2 }
 0x14a   : > { %v665_v40 = vadd.s32 %v2499_v37, %v2491_v55  ;;  %v465_v24 = vand.u32 65535, %v2588_v2  ;;  %v466_v50 = vshrl.u32 %v2588_v2, 16  ;;  %v490_v53 = vshrl.u32 %v459_v27, 16 }
 0x14b   : > { %vm1986_vm4 = vcmp.lt.s32.totalorder %v1985_v17, 0  ;;  %v860_v25 = vadd.f32 1.0, %v859_v59  ;;  %v867_v51 = vadd.f32 1.0, %v866_v38  ;;  %v489_v60 = vand.u32 65535, %v459_v27 }
 0x14c   : > { %v680_v34 = vsel %vm1986_vm4, 0, %v1985_v17  ;;  %v470_v52 = vmul.u32 %v468_v22, %v465_v24  ;;  %v469_v12 = vmul.u32 %v467_v58, %v465_v24  ;;  %v471_v21 = vmul.u32 %v467_v58, %v466_v50 }
 0x14d   : > { %v681_v19 = vsub.s32 32, %v680_v34  ;;  %v685_v26 = vsub.s32 4294967266, %v680_v34  ;;  %v868_v61 = vmul.f32 %v867_v51, %v852_v39  ;;  %v877_v42 = vxor.u32 2147483648, %v860_v25 }
 0x14e   : > { %v682_v48 = vshll.u32 %v673_v6, %v680_v34  ;;  %v473_v55 = vshll.u32 %v470_v52, 16  ;;  %v472_v57 = vmul.u32 %v468_v22, %v466_v50  ;;  %v475_v9 = vshll.u32 %v471_v21, 16 }
 0x14f   : > { %v683_v5 = vshrl.u32 %v665_v40, %v681_v19  ;;  %v686_v32 = vadd.s32 127, %v685_v26  ;;  %v874_v37 = vxor.u32 2147483648, %v868_v61  ;;  %v878_v4 = vsel %vm876_vm2, %v877_v42, %v868_v61 }
 0x150   : > { %vm477_vm8 = vc.u32 %v469_v12, %v473_v55  ;;  %v479_v35 = vadd.s32 %v473_v55, %v469_v12  ;;  %v492_v6 = vmul.u32 %v490_v53, %v465_v24  ;;  %vm869_vm6 = vweird.f32 %v2199_v43 }
 0x151   : > { %v684_v28 = vor.u32 %v683_v5, %v682_v48  ;;  %v687_v46 = vshll.u32 %v686_v32, 23  ;;  %v875_v39 = vsel %vm873_vm1, %v860_v25, %v874_v37  ;;  %v478_v3 = vsel %vm477_vm8, 1, %v2059_v10 }
 0x152   : > { %v879_v7 = vsel %vm872_vm3, %v875_v39, %v878_v4  ;;  %v480_v20 = vadd.s32 %v478_v3, %v472_v57  ;;  %vm481_vm7 = vc.u32 %v479_v35, %v475_v9  ;;  %v491_v11 = vmul.u32 %v489_v60, %v465_v24 }
 0x153   : > { %v688_v14 = vor.u32 4788187, %v687_v46  ;;  %v880_v54 = vsel %vm869_vm6, nan, %v879_v7  ;;  %v493_v16 = vmul.u32 %v489_v60, %v466_v50  ;;  %v691_v45 = vcvt.s32.f32 %v684_v28 }
 0x154   : > { %1090 = vmatpush.msra.mxu1 %v880_v54  ;;  %v482_v8 = vsel %vm481_vm7, 1, %v2059_v10  ;;  %v495_v29 = vshll.u32 %v492_v6, 16  ;;  %v474_v17 = vshrl.u32 %v470_v52, 16  ;;  %v494_v59 = vmul.u32 %v490_v53, %v466_v50 }
 0x155   : > { %v689_v1 = vand.u32 2147483647, %v688_v14  ;;  %v484_v27 = vadd.s32 %v482_v8, %v480_v20  ;;  %v497_v43 = vshll.u32 %v493_v16, 16  ;;  %v432_v58 = vshrl.u32 %v2063_v18, %v2213_v56 }
 0x156   : > { %vm499_vm9 = vc.u32 %v491_v11, %v495_v29  ;;  %v501_v47 = vadd.s32 %v495_v29, %v491_v11  ;;  %v453_v25 = vsel %vm451_vm5, %v2559_v44, 2102212464  ;;  %v3348_v34 = vand.u32 2147483647, %v2196_v36 }
 0x157   : > { %v692_v38 = vmul.f32 %v691_v45, %v689_v1  ;;  %v485_v22 = vadd.s32 %v484_v27, %v474_v17  ;;  %v500_v40 = vsel %vm499_vm9, 1, %v2059_v10  ;;  %vm573_vm12 = vcmp.lt.s32.totalorder %v2196_v36, 0 }
 0x158   : > { %v502_v51 = vadd.s32 %v500_v40, %v494_v59  ;;  %vm503_vm10 = vc.u32 %v501_v47, %v497_v43  ;;  %vm2616_vm11 = vcmp.le.f32.partialorder %v3348_v34, 0.7853982  ;;  %v476_v19 = vshrl.u32 %v471_v21, 16 }
 0x159   : > { %v693_v24 = vxor.u32 2147483648, %v692_v38  ;;  %v504_v56 = vsel %vm503_vm10, 1, %v2059_v10  ;;  %v452_v44 = vsel %vm448_vm13, %v432_v58, %v2546_v31  ;;  %v496_v52 = vshrl.u32 %v492_v6, 16 }
 0x15a   : > { %v506_v53 = vadd.s32 %v504_v56, %v502_v51  ;;  %v695_v61 = vsub.s32 4, %v2544_v49  ;;  %v454_v12 = vsel %vm450_vm14, %v2553_v41, %v453_v25  ;;  %v486_v21 = vadd.s32 %v485_v22, %v476_v19 }
 0x15b   : > { %v694_v26 = vsel %vm573_vm12, %v693_v24, %v692_v38  ;;  %v498_v5 = vshrl.u32 %v493_v16, 16  ;;  %v505_v55 = vadd.s32 %v501_v47, %v497_v43  ;;  %v455_v31 = vsel %vm449_vm15, %v452_v44, %v454_v12 }
 0x15c   : > { %v697_v42 = vsel %vm2616_vm11, %v2196_v36, %v694_v26  ;;  %v507_v32 = vadd.s32 %v506_v53, %v496_v52  ;;  %v696_v60 = vsel %vm573_vm12, %v695_v61, %v2544_v49  ;;  %v509_v41 = vmul.u32 %v2588_v2, %v455_v31 }
 0x15d   : > { %v699_v48 = vmul.f32 %v697_v42, %v697_v42  ;;  %vm511_vm5 = vc.u32 %v486_v21, %v505_v55  ;;  %v698_v39 = vsel %vm2616_vm11, 0, %v696_v60  ;;  %vm714_vm1 = vweird.f32 %v2196_v36 }
 0x15e   : > { %v508_v57 = vadd.s32 %v507_v32, %v498_v5  ;;  %v715_v20 = vadd.s32 3, %v698_v39  ;;  %v510_v34 = vadd.s32 %v505_v55, %v486_v21  ;;  %vm418_vm2 = vcmp.lt.s32.totalorder %v2193_v30, 0 }
 0x15f   : > { %v700_v37 = vmul.f32 -0.001358992, %v699_v48  ;;  %v707_v4 = vmul.f32 -0.00019511016, %v699_v48  ;;  %vm417_vm4 = vcmp.le.f32.partialorder %v416_v62, 0.7853982  ;;  %vm559_vm9 = vweird.f32 %v2193_v30 }
 0x160   : > { %v512_v35 = vadd.s32 1, %v508_v57  ;;  %v716_v8 = vand.u32 3, %v715_v20  ;;  %vm1064_vm10 = vcmask 261120  }
 0x161   : > { %v701_v28 = vadd.f32 0.041655596, %v700_v37  ;;  %v708_v46 = vadd.f32 0.008332121, %v707_v4 }
 0x162   : > { %v513_v6 = vsel %vm511_vm5, %v512_v35, %v508_v57  ;;  %vm718_vm13 = vcmp.eq.s32.totalorder %v716_v8, 0  ;;  %vm721_vm14 = vcmp.eq.s32.totalorder %v716_v8, 2  ;;  %vm717_vm0 = vcmp.lt.s32.totalorder %v716_v8, 2 }
 0x163   : > { %v702_v9 = vmul.f32 %v701_v28, %v699_v48  ;;  %v709_v3 = vmul.f32 %v708_v46, %v699_v48  ;;  %v514_v7 = vadd.s32 %v513_v6, %v509_v41 }
 0x165   : > { %v703_v63 = vadd.f32 -0.4999988, %v702_v9  ;;  %v710_v14 = vadd.f32 -0.16666654, %v709_v3  ;;  %v515_v54 = vadd.s32 536870912, %v514_v7 }
 0x167   : > { %v704_v11 = vmul.f32 %v703_v63, %v699_v48  ;;  %v711_v16 = vmul.f32 %v710_v14, %v699_v48  ;;  %v516_v49 = vshrl.u32 %v515_v54, 30  ;;  %v1040_v54 = vld [vmem:[%s3327_s4] sm:$0xff] }
 0x168   : > { %1046 = vperm.xlu2 %2049, %v1040_v54  }
 0x169   : > { %v705_v1 = vadd.f32 1.0, %v704_v11  ;;  %v712_v45 = vadd.f32 1.0, %v711_v16  ;;  %v517_v29 = vshll.u32 %v516_v49, 30  ;;  %v540_v32 = vsub.s32 4, %v516_v49 }
 0x16b   : > { %v713_v17 = vmul.f32 %v712_v45, %v697_v42  ;;  %v722_v2 = vxor.u32 2147483648, %v705_v1  ;;  %v518_v27 = vsub.s32 %v514_v7, %v517_v29  ;;  %v541_v31 = vsel %vm418_vm2, %v540_v32, %v516_v49  ;;  %v1036_v45 = vld [vmem:[%s3326_s3] sm:$0xff]  ;;  %v1041_v29 = vld [vmem:[%s3327_s4 + $0x8] sm:$0xff] }
 0x16c   : > { %v543_v28 = vsel %vm417_vm4, 0, %v541_v31 }
 0x16d   : > { %v719_v59 = vxor.u32 2147483648, %v713_v17  ;;  %vm519_vm15 = vcmp.lt.s32.totalorder %v518_v27, 0  ;;  %v520_v38 = vsub.s32 0, %v518_v27  ;;  %v723_v47 = vsel %vm721_vm14, %v722_v2, %v713_v17  ;;  %v1037_v17 = vld [vmem:[%s3326_s3 + $0x8] sm:$0xff]  ;;  %v1039_v2 = vld [vmem:[%s3326_s3 + $0x18] sm:$0xff] }
 0x16e   : > { %v560_v9 = vadd.s32 3, %v543_v28 }
 0x16f   : > { %v720_v43 = vsel %vm718_vm13, %v705_v1, %v719_v59  ;;  %v521_v22 = vsel %vm519_vm15, %v520_v38, %v518_v27 }
 0x170   : > { %v724_v58 = vsel %vm717_vm0, %v720_v43, %v723_v47  ;;  %v522_v24 = vclz %v521_v22  ;;  %v561_v63 = vand.u32 3, %v560_v9  ;;  %1051 = vperm.xlu2 %2049, %v1041_v29  }
 0x171   : > { %v725_v40 = vsel %vm714_vm1, nan, %v724_v58 }
 0x172   : > { %1091 = vmatpush.msra.mxu1 %v725_v40  ;;  %v1982_v25 = vadd.s32 4294967294, %v522_v24  ;;  %vm563_vm8 = vcmp.eq.s32.totalorder %v561_v63, 0  ;;  %vm566_vm6 = vcmp.eq.s32.totalorder %v561_v63, 2  ;;  %vm562_vm7 = vcmp.lt.s32.totalorder %v561_v63, 2 }
 0x174   : > { %vm1983_vm3 = vcmp.lt.s32.totalorder %v1982_v25, 0 }
 0x175   : > { %v525_v51 = vsel %vm1983_vm3, 0, %v1982_v25 }
 0x176   : > { %v526_v50 = vsub.s32 32, %v525_v51  ;;  %v530_v19 = vsub.s32 4294967266, %v525_v51  ;;  %v527_v56 = vshll.u32 %v518_v27, %v525_v51 }
 0x178   : > { %v528_v26 = vshrl.u32 %v510_v34, %v526_v50  ;;  %v531_v44 = vadd.s32 127, %v530_v19 }
 0x17a   : > { %v529_v52 = vor.u32 %v528_v26, %v527_v56  ;;  %v532_v53 = vshll.u32 %v531_v44, 23 }
 0x17c   : > { %v533_v61 = vor.u32 4788187, %v532_v53  ;;  %v536_v12 = vcvt.s32.f32 %v529_v52 }
 0x17e   : > { %v534_v42 = vand.u32 2147483647, %v533_v61 }
 0x180   : > { %v537_v36 = vmul.f32 %v536_v12, %v534_v42 }
 0x182   : > { %v538_v48 = vxor.u32 2147483648, %v537_v36 }
 0x184   : > { %v539_v5 = vsel %vm418_vm2, %v538_v48, %v537_v36  ;;  %v1057_v36 = vpop.permute.xlu0 %1056 }
 0x185   : > { %v542_v21 = vsel %vm417_vm4, %v2193_v30, %v539_v5  ;;  %v1038_v30 = vld [vmem:[%s3326_s3 + $0x10] sm:$0xff] }
 0x186   : > { %v544_v55 = vmul.f32 %v542_v21, %v542_v21 }
 0x188   : > { %v545_v37 = vmul.f32 -0.001358992, %v544_v55  ;;  %v552_v4 = vmul.f32 -0.00019511016, %v544_v55 }
 0x18a   : > { %v546_v57 = vadd.f32 0.041655596, %v545_v37  ;;  %v553_v60 = vadd.f32 0.008332121, %v552_v4 }
 0x18c   : > { %v547_v46 = vmul.f32 %v546_v57, %v544_v55  ;;  %v554_v35 = vmul.f32 %v553_v60, %v544_v55 }
 0x18e   : > { %v548_v41 = vadd.f32 -0.4999988, %v547_v46  ;;  %v555_v39 = vadd.f32 -0.16666654, %v554_v35 }
 0x190   : > { %v549_v3 = vmul.f32 %v548_v41, %v544_v55  ;;  %v556_v6 = vmul.f32 %v555_v39, %v544_v55 }
 0x192   : > { %v550_v7 = vadd.f32 1.0, %v549_v3  ;;  %v557_v62 = vadd.f32 1.0, %v556_v6 }
 0x194   : > { %v558_v14 = vmul.f32 %v557_v62, %v542_v21  ;;  %v567_v20 = vxor.u32 2147483648, %v550_v7 }
 0x196   : > { %v564_v11 = vxor.u32 2147483648, %v558_v14  ;;  %v568_v49 = vsel %vm566_vm6, %v567_v20, %v558_v14 }
 0x198   : > { %v565_v16 = vsel %vm563_vm8, %v550_v7, %v564_v11 }
 0x199   : > { %v569_v1 = vsel %vm562_vm7, %v565_v16, %v568_v49 }
 0x19a   : > { %v570_v8 = vsel %vm559_vm9, nan, %v569_v1 }
 0x19b   : > { %1092 = vmatpush.msra.mxu1 %v570_v8 }
 0x19c   : > { %1993 = vmatmul.msk.f32.vlgmr.msra.gmra.mxu1 %vm1064_vm10, %v1036_v45 }
 0x1a4   : > { %1994 = vmatmul.msk.f32.gmra.mxu1 %vm1064_vm10, %v1037_v17 }
 0x1ac   : > { %1995 = vmatmul.msk.f32.gmra.mxu1 %vm1064_vm10, %v1038_v30 }
 0x1b4   : > { %1996 = vmatmul.msk.f32.gmra.mxu1 %vm1064_vm10, %v1039_v2 }
 0x1c2   : > { %v1047_v27 = vpop.permute.xlu2 %1046 }
 0x1ca   : > { %v1052_v22 = vpop.permute.xlu2 %1051 }
 0x219   : > { %v1094_v59 = vpop.f32.mrf.mxu1 }
 0x21a   : > { %v2670_v38 = vadd.f32 %v1094_v59, %v1047_v27 }
 0x21c   : > { %v1109_v43 = vand.u32 2139095040, %v2670_v38  ;;  %v3339_v40 = vand.u32 2147483647, %v2670_v38 }
 0x21e   : > { %v1110_v47 = vshrl.u32 %v1109_v43, 23  ;;  %v1113_v34 = vand.u32 8388607, %v3339_v40 }
 0x220   : > { %v1997_v58 = vadd.s32 4294967169, %v1110_v47  ;;  %v1114_v26 = vor.u32 8388608, %v1113_v34 }
 0x221   : > { %v1097_v24 = vpop.f32.mrf.mxu1 }
 0x222   : > { %v1116_v25 = vadd.s32 1, %v1997_v58  ;;  %v2674_v51 = vadd.f32 %v1097_v24, %v1052_v22  ;;  %v2679_v61 = vshll.u32 %v1114_v26, 8 }
 0x224   : > { %vm1117_vm11 = vcmp.gt.s32.totalorder %v1116_v25, 0  ;;  %v1264_v50 = vand.u32 2139095040, %v2674_v51  ;;  %v3338_v42 = vand.u32 2147483647, %v2674_v51  ;;  %v2689_v55 = vand.u32 65535, %v2679_v61 }
 0x225   : > { %v1118_v56 = vsel %vm1117_vm11, %v1116_v25, 0 }
 0x226   : > { %v1265_v19 = vshrl.u32 %v1264_v50, 23  ;;  %v1120_v44 = vand.u32 31, %v1118_v56  ;;  %v2686_v21 = vshrl.u32 %v1118_v56, 5  ;;  %v1268_v37 = vand.u32 8388607, %v3338_v42 }
 0x227   : > { %v2737_v56 = vshrl.u32 %v2679_v61, 16 }
 0x228   : > { %v2000_v52 = vadd.s32 4294967169, %v1265_v19  ;;  %v2682_v48 = vsub.s32 32, %v1120_v44  ;;  %v1123_v31 = vshll.u32 %v2063_v18, %v1120_v44  ;;  %v1126_v57 = vshll.u32 %v2064_v23, %v1120_v44 }
 0x229   : > { %v1100_v53 = vpop.f32.mrf.mxu1  ;;  %v1129_v60 = vshll.u32 %v2065_v33, %v1120_v44  ;;  %v1132_v28 = vshll.u32 %v2060_v0, %v1120_v44  ;;  %v1135_v35 = vshll.u32 %v3341_v13, %v1120_v44  ;;  %v1269_v30 = vor.u32 8388608, %v1268_v37  ;;  %v1062_v37 = vpop.permute.xlu1 %1061 }
 0x22a   : > { %v1271_v12 = vadd.s32 1, %v2000_v52  ;;  %v2684_v5 = vadd.f32 %v1100_v53, %v1057_v36  ;;  %v1124_v46 = vshrl.u32 %v2064_v23, %v2682_v48  ;;  %v1127_v9 = vshrl.u32 %v2065_v33, %v2682_v48 }
 0x22b   : > { %v1130_v3 = vshrl.u32 %v2060_v0, %v2682_v48  ;;  %v1133_v6 = vshrl.u32 %v3341_v13, %v2682_v48  ;;  %v1136_v1 = vshrl.u32 %v2062_v15, %v2682_v48  ;;  %vm1138_vm15 = vcmp.lt.s32.totalorder %v2686_v21, 1 }
 0x22c   : > { %vm1272_vm12 = vcmp.gt.s32.totalorder %v1271_v12, 0  ;;  %v1419_v39 = vand.u32 2139095040, %v2684_v5  ;;  %v2719_v17 = vor.u32 %v1124_v46, %v1123_v31  ;;  %v2721_v59 = vor.u32 %v1127_v9, %v1126_v57 }
 0x22d   : > { %v1273_v32 = vsel %vm1272_vm12, %v1271_v12, 0  ;;  %v1134_v43 = vor.u32 %v1133_v6, %v1132_v28  ;;  %v3337_v50 = vand.u32 2147483647, %v2684_v5  ;;  %v1137_v19 = vor.u32 %v1136_v1, %v1135_v35 }
 0x22e   : > { %v1275_v4 = vand.u32 31, %v1273_v32  ;;  %v2707_v7 = vshrl.u32 %v1273_v32, 5  ;;  %v1420_v29 = vshrl.u32 %v1419_v39, 23  ;;  %v2739_v44 = vor.u32 %v1130_v3, %v1129_v60 }
 0x22f   : > { %vm1141_vm0 = vcmp.lt.s32.totalorder %v2686_v21, 4  ;;  %v2749_v32 = vshll.u32 %v1269_v30, 8  ;;  %vm1140_vm2 = vcmp.lt.s32.totalorder %v2686_v21, 3  ;;  %v1423_v57 = vand.u32 8388607, %v3337_v50 }
 0x230   : > { %v1276_v41 = vsub.s32 32, %v1275_v4  ;;  %v1281_v62 = vshll.u32 %v2064_v23, %v1275_v4  ;;  %v1284_v14 = vshll.u32 %v2065_v33, %v1275_v4  ;;  %v1287_v54 = vshll.u32 %v2060_v0, %v1275_v4 }
 0x231   : > { %v1290_v16 = vshll.u32 %v3341_v13, %v1275_v4  ;;  %vm1296_vm5 = vcmp.lt.s32.totalorder %v2707_v7, 4  ;;  %vm1293_vm13 = vcmp.lt.s32.totalorder %v2707_v7, 1  ;;  %vm1295_vm14 = vcmp.lt.s32.totalorder %v2707_v7, 3  ;;  %v1103_v53 = vpop.f32.mrf.mxu1 }
 0x232   : > { %v1282_v63 = vshrl.u32 %v2065_v33, %v1276_v41  ;;  %v1285_v20 = vshrl.u32 %v2060_v0, %v1276_v41  ;;  %v1288_v11 = vshrl.u32 %v3341_v13, %v1276_v41  ;;  %v1291_v49 = vshrl.u32 %v2062_v15, %v1276_v41 }
 0x233   : > { %v1279_v47 = vshrl.u32 %v2064_v23, %v1276_v41  ;;  %v2003_v22 = vadd.s32 4294967169, %v1420_v29  ;;  %v1278_v24 = vshll.u32 %v2063_v18, %v1275_v4  ;;  %vm1294_vm1 = vcmp.lt.s32.totalorder %v2707_v7, 2 }
 0x234   : > { %v1283_v45 = vor.u32 %v1282_v63, %v1281_v62  ;;  %v1286_v8 = vor.u32 %v1285_v20, %v1284_v14  ;;  %v1289_v2 = vor.u32 %v1288_v11, %v1287_v54  ;;  %v1292_v27 = vor.u32 %v1291_v49, %v1290_v16 }
 0x235   : > { %v1426_v26 = vadd.s32 1, %v2003_v22  ;;  %v1280_v52 = vor.u32 %v1279_v47, %v1278_v24  ;;  %v2756_v4 = vsel %vm1138_vm15, %v2719_v17, %v2721_v59  ;;  %v1147_v31 = vsel %vm1141_vm0, %v1134_v43, 920167782 }
 0x236   : > { %v1306_v58 = vsel %vm1296_vm5, %v1292_v27, 1326507024  ;;  %v1305_v25 = vsel %vm1293_vm13, %v1283_v45, %v1286_v8  ;;  %v1302_v12 = vsel %vm1296_vm5, %v1289_v2, 920167782  ;;  %v1151_v60 = vsel %vm1141_vm0, %v1137_v19, 1326507024 }
 0x237   : > { %v1307_v34 = vsel %vm1295_vm14, %v1289_v2, %v1306_v58  ;;  %vm1427_vm3 = vcmp.gt.s32.totalorder %v1426_v26, 0  ;;  %v1277_v28 = vshrl.u32 %v2063_v18, %v1276_v41  ;;  %v1298_v46 = vsel %vm1296_vm5, %v1286_v8, 2102212464 }
 0x238   : > { %v2747_v36 = vsel %vm1294_vm1, %v1305_v25, %v1307_v34  ;;  %v2767_v35 = vadd.f32 %v1103_v53, %v1062_v37  ;;  %v1301_v39 = vsel %vm1293_vm13, %v1280_v52, %v1283_v45  ;;  %v1303_v9 = vsel %vm1295_vm14, %v1286_v8, %v1302_v12 }
 0x239   : > { %v1313_v3 = vshrl.u32 %v2747_v36, 16  ;;  %v1428_v6 = vsel %vm1427_vm3, %v1426_v26, 0  ;;  %v2777_v62 = vsel %vm1140_vm2, %v2739_v44, %v1147_v31  ;;  %v2783_v41 = vsel %vm1138_vm15, %v2721_v59, %v2739_v44 }
 0x23a   : > { %v2786_v63 = vand.u32 65535, %v2749_v32  ;;  %v1430_v14 = vand.u32 31, %v1428_v6  ;;  %v2790_v20 = vsel %vm1140_vm2, %v1134_v43, %v1151_v60  ;;  %v1297_v54 = vsel %vm1293_vm13, %v1277_v28, %v1280_v52 }
 0x23b   : > { %v2795_v11 = vshrl.u32 %v2749_v32, 16  ;;  %v1424_v16 = vor.u32 8388608, %v1423_v57  ;;  %v1299_v49 = vsel %vm1295_vm14, %v1283_v45, %v1298_v46  ;;  %v2801_v1 = vsel %vm1294_vm1, %v1301_v39, %v1303_v9 }
 0x23c   : > { %v1312_v8 = vand.u32 65535, %v2747_v36  ;;  %v1431_v29 = vsub.s32 32, %v1430_v14  ;;  %v2807_v30 = vmul.u32 %v1313_v3, %v2786_v63  ;;  %v1429_v2 = vshrl.u32 %v1428_v6, 5 }
 0x23d   : > { %v1436_v27 = vshll.u32 %v2064_v23, %v1430_v14  ;;  %v1574_v43 = vand.u32 2139095040, %v2767_v35  ;;  %v1439_v45 = vshll.u32 %v2065_v33, %v1430_v14  ;;  %v1442_v22 = vshll.u32 %v2060_v0, %v1430_v14 }
 0x23e   : > { %v1437_v47 = vshrl.u32 %v2065_v33, %v1431_v29  ;;  %v1440_v58 = vshrl.u32 %v2060_v0, %v1431_v29  ;;  %v1434_v24 = vshrl.u32 %v2064_v23, %v1431_v29  ;;  %v1443_v25 = vshrl.u32 %v3341_v13, %v1431_v29 }
 0x23f   : > { %v1445_v34 = vshll.u32 %v3341_v13, %v1430_v14  ;;  %v1446_v19 = vshrl.u32 %v2062_v15, %v1431_v29  ;;  %v2821_v26 = vsel %vm1294_vm1, %v1297_v54, %v1299_v49  ;;  %v1433_v52 = vshll.u32 %v2063_v18, %v1430_v14 }
 0x240   : > { %v1441_v53 = vor.u32 %v1440_v58, %v1439_v45  ;;  %v2824_v12 = vshll.u32 %v1424_v16, 8  ;;  %v1438_v37 = vor.u32 %v1437_v47, %v1436_v27  ;;  %v1444_v31 = vor.u32 %v1443_v25, %v1442_v22 }
 0x241   : > { %v1447_v57 = vor.u32 %v1446_v19, %v1445_v34  ;;  %v1575_v60 = vshrl.u32 %v1574_v43, 23  ;;  %v1318_v28 = vshll.u32 %v2807_v30, 16  ;;  %v1334_v46 = vand.u32 65535, %v2801_v1 }
 0x242   : > { %vm1451_vm4 = vcmp.lt.s32.totalorder %v1429_v2, 4  ;;  %v3336_v39 = vand.u32 2147483647, %v2767_v35  ;;  %v1314_v7 = vmul.u32 %v1312_v8, %v2786_v63  ;;  %v1435_v9 = vor.u32 %v1434_v24, %v1433_v52 }
 0x243   : > { %v1461_v6 = vsel %vm1451_vm4, %v1447_v57, 1326507024  ;;  %v2006_v54 = vadd.s32 4294967169, %v1575_v60  ;;  %v1432_v14 = vshrl.u32 %v2063_v18, %v1431_v29  ;;  %vm1448_vm8 = vcmp.lt.s32.totalorder %v1429_v2, 1 }
 0x244   : > { %vm1450_vm6 = vcmp.lt.s32.totalorder %v1429_v2, 3  ;;  %v1453_v16 = vsel %vm1451_vm4, %v1441_v53, 2102212464  ;;  %v1457_v49 = vsel %vm1451_vm4, %v1444_v31, 920167782  ;;  %v1460_v27 = vsel %vm1448_vm8, %v1438_v37, %v1441_v53 }
 0x245   : > { %v1462_v43 = vsel %vm1450_vm6, %v1444_v31, %v1461_v6  ;;  %v1581_v47 = vadd.s32 1, %v2006_v54  ;;  %vm2833_vm7 = vc.u32 %v1314_v7, %v1318_v28  ;;  %v1335_v58 = vshrl.u32 %v2801_v1, 16 }
 0x246   : > { %v1578_v29 = vand.u32 8388607, %v3336_v39  ;;  %vm1449_vm9 = vcmp.lt.s32.totalorder %v1429_v2, 2  ;;  %v1452_v24 = vsel %vm1448_vm8, %v1432_v14, %v1435_v9  ;;  %v1454_v25 = vsel %vm1450_vm6, %v1438_v37, %v1453_v16 }
 0x247   : > { %vm1582_vm11 = vcmp.gt.s32.totalorder %v1581_v47, 0  ;;  %v2845_v34 = vmul.u32 %v1312_v8, %v2795_v11  ;;  %v1456_v19 = vsel %vm1448_vm8, %v1435_v9, %v1438_v37  ;;  %v1458_v52 = vsel %vm1450_vm6, %v1441_v53, %v1457_v49 }
 0x248   : > { %v1463_v1 = vsel %vm1449_vm9, %v1460_v27, %v1462_v43  ;;  %v1317_v31 = vmul.u32 %v1313_v3, %v2795_v11  ;;  %v2854_v57 = vmul.u32 %v1334_v46, %v2786_v63  ;;  %v1465_v60 = vand.u32 65535, %v2824_v12 }
 0x249   : > { %v1466_v6 = vshrl.u32 %v2824_v12, 16  ;;  %v1323_v8 = vsel %vm2833_vm7, 1, %v2059_v10  ;;  %v2862_v37 = vsel %vm1449_vm9, %v1452_v24, %v1454_v25  ;;  %v1579_v53 = vor.u32 8388608, %v1578_v29 }
 0x24a   : > { %v1583_v9 = vsel %vm1582_vm11, %v1581_v47, 0  ;;  %v1459_v54 = vsel %vm1449_vm9, %v1456_v19, %v1458_v52  ;;  %v1467_v36 = vand.u32 65535, %v1463_v1  ;;  %v1468_v3 = vshrl.u32 %v1463_v1, 16 }
 0x24b   : > { %v1585_v14 = vand.u32 31, %v1583_v9  ;;  %v1320_v16 = vshll.u32 %v2845_v34, 16  ;;  %v2867_v49 = vmul.u32 %v1335_v58, %v2786_v63  ;;  %v2870_v27 = vmul.u32 %v1334_v46, %v2795_v11 }
 0x24c   : > { %v2873_v43 = vmul.u32 %v1335_v58, %v2795_v11  ;;  %v2875_v45 = vadd.s32 %v1318_v28, %v1314_v7  ;;  %v2877_v29 = vadd.s32 %v1323_v8, %v1317_v31  ;;  %v1122_v47 = vshrl.u32 %v2063_v18, %v2682_v48 }
 0x24d   : > { %v2879_v2 = vsub.s32 32, %v1585_v14  ;;  %v1489_v24 = vand.u32 65535, %v1459_v54  ;;  %v1490_v25 = vshrl.u32 %v1459_v54, 16  ;;  %v2885_v19 = vshll.u32 %v1579_v53, 8 }
 0x24e   : > { %v1469_v46 = vmul.u32 %v1467_v36, %v1465_v60  ;;  %v2887_v52 = vmul.u32 %v1468_v3, %v1465_v60  ;;  %vm1139_vm12 = vcmp.lt.s32.totalorder %v2686_v21, 2  ;;  %v2893_v11 = vsel %vm1138_vm15, %v1122_v47, %v2719_v17 }
 0x24f   : > { %v2895_v28 = vmul.u32 %v1467_v36, %v1466_v6  ;;  %v1592_v48 = vshrl.u32 %v2065_v33, %v2879_v2  ;;  %v1600_v7 = vshll.u32 %v3341_v13, %v1585_v14  ;;  %v1601_v58 = vshrl.u32 %v2062_v15, %v2879_v2 }
 0x250   : > { %v1472_v1 = vmul.u32 %v1468_v3, %v1466_v6  ;;  %v2902_v31 = vshrl.u32 %v1583_v9, 5  ;;  %v1595_v8 = vshrl.u32 %v2060_v0, %v2879_v2  ;;  %v1598_v17 = vshrl.u32 %v3341_v13, %v2879_v2 }
 0x251   : > { %v2908_v53 = vmul.u32 %v1489_v24, %v1465_v60  ;;  %v2910_v54 = vmul.u32 %v1490_v25, %v1465_v60  ;;  %v1591_v36 = vshll.u32 %v2064_v23, %v1585_v14  ;;  %v1602_v47 = vor.u32 %v1601_v58, %v1600_v7 }
 0x252   : > { %v1473_v39 = vshll.u32 %v2887_v52, 16  ;;  %v1589_v15 = vshrl.u32 %v2064_v23, %v2879_v2  ;;  %v1594_v9 = vshll.u32 %v2065_v33, %v1585_v14  ;;  %v1597_v3 = vshll.u32 %v2060_v0, %v1585_v14 }
 0x253   : > { %v2918_v50 = vmul.u32 %v1489_v24, %v1466_v6  ;;  %v1588_v13 = vshll.u32 %v2063_v18, %v1585_v14  ;;  %v2921_v42 = vor.u32 %v1592_v48, %v1591_v36  ;;  %v1153_v60 = vsel %vm1139_vm12, %v2783_v41, %v2790_v20 }
 0x254   : > { %v1596_v7 = vor.u32 %v1595_v8, %v1594_v9  ;;  %v1599_v58 = vor.u32 %v1598_v17, %v1597_v3  ;;  %vm1606_vm5 = vcmp.lt.s32.totalorder %v2902_v31, 4  ;;  %v1157_v23 = vand.u32 65535, %v1153_v60 }
 0x255   : > { %v1475_v33 = vshll.u32 %v2895_v28, 16  ;;  %v2929_v40 = vmul.u32 %v1490_v25, %v1466_v6  ;;  %v1616_v0 = vsel %vm1606_vm5, %v1602_v47, 1326507024  ;;  %v1158_v14 = vshrl.u32 %v1153_v60, 16 }
 0x256   : > { %vm1477_vm13 = vc.u32 %v1469_v46, %v1473_v39  ;;  %v2933_v24 = vor.u32 %v1589_v15, %v1588_v13  ;;  %v2936_v48 = vand.u32 65535, %v2885_v19  ;;  %v1143_v41 = vsel %vm1141_vm0, %v2739_v44, 2102212464 }
 0x257   : > { %vm1603_vm14 = vcmp.lt.s32.totalorder %v2902_v31, 1  ;;  %vm1605_vm15 = vcmp.lt.s32.totalorder %v2902_v31, 3  ;;  %v1149_v20 = vsel %vm1139_vm12, %v2756_v4, %v2777_v62  ;;  %v1160_v6 = vmul.u32 %v1158_v14, %v2689_v55 }
 0x258   : > { %v1612_v25 = vsel %vm1606_vm5, %v1599_v58, 920167782  ;;  %v1615_v8 = vsel %vm1603_vm14, %v2921_v42, %v1596_v7  ;;  %v1617_v44 = vsel %vm1605_vm15, %v1599_v58, %v1616_v0  ;;  %v1161_v17 = vmul.u32 %v1157_v23, %v2737_v56 }
 0x259   : > { %v1478_v36 = vsel %vm1477_vm13, 1, %v2059_v10  ;;  %v2957_v47 = vadd.s32 %v1473_v39, %v1469_v46  ;;  %v2960_v4 = vshrl.u32 %v2885_v19, 16  ;;  %v1144_v62 = vsel %vm1140_vm2, %v2721_v59, %v1143_v41 }
 0x25a   : > { %vm1604_vm0 = vcmp.lt.s32.totalorder %v2902_v31, 2  ;;  %v1611_v15 = vsel %vm1603_vm14, %v2933_v24, %v2921_v42  ;;  %v1159_v9 = vmul.u32 %v1157_v23, %v2689_v55  ;;  %v1163_v3 = vshll.u32 %v1160_v6, 16 }
 0x25b   : > { %v1613_v39 = vsel %vm1605_vm15, %v1596_v7, %v1612_v25  ;;  %v2975_v46 = vsel %vm1604_vm0, %v1615_v8, %v1617_v44  ;;  %v1179_v13 = vand.u32 65535, %v1149_v20  ;;  %v1180_v60 = vshrl.u32 %v1149_v20, 16 }
 0x25c   : > { %v1162_v59 = vmul.u32 %v1158_v14, %v2737_v56  ;;  %v1165_v58 = vshll.u32 %v1161_v17, 16  ;;  %vm1167_vm1 = vc.u32 %v1159_v9, %v1163_v3  ;;  %v1169_v0 = vadd.s32 %v1163_v3, %v1159_v9 }
 0x25d   : > { %v2978_v41 = vadd.s32 %v1478_v36, %v1472_v1  ;;  %v2982_v23 = vshrl.u32 %v2063_v18, %v2879_v2  ;;  %v1168_v63 = vsel %vm1167_vm1, 1, %v2059_v10  ;;  %v1182_v25 = vmul.u32 %v1180_v60, %v2689_v55 }
 0x25e   : > { %v2988_v8 = vsel %vm1604_vm0, %v1611_v15, %v1613_v39  ;;  %v1170_v20 = vadd.s32 %v1168_v63, %v1162_v59  ;;  %vm1171_vm3 = vc.u32 %v1169_v0, %v1165_v58  ;;  %v1183_v14 = vmul.u32 %v1179_v13, %v2737_v56 }
 0x25f   : > { %v1622_v44 = vand.u32 65535, %v2975_v46  ;;  %v1172_v1 = vsel %vm1171_vm3, 1, %v2059_v10  ;;  %v1181_v36 = vmul.u32 %v1179_v13, %v2689_v55  ;;  %v1185_v18 = vshll.u32 %v1182_v25, 16 }
 0x260   : > { %v1623_v2 = vshrl.u32 %v2975_v46, 16  ;;  %v1145_v9 = vsel %vm1139_vm12, %v2893_v11, %v1144_v62  ;;  %v1164_v3 = vshrl.u32 %v1160_v6, 16  ;;  %v1174_v15 = vadd.s32 %v1172_v1, %v1170_v20 }
 0x261   : > { %v1184_v63 = vmul.u32 %v1180_v60, %v2737_v56  ;;  %v1187_v39 = vshll.u32 %v1183_v14, 16  ;;  %vm1189_vm2 = vc.u32 %v1181_v36, %v1185_v18  ;;  %v1191_v59 = vadd.s32 %v1185_v18, %v1181_v36 }
 0x262   : > { %v3001_v58 = vsel %vm1606_vm5, %v1596_v7, 2102212464  ;;  %v1645_v55 = vshrl.u32 %v2988_v8, 16  ;;  %v1175_v13 = vadd.s32 %v1174_v15, %v1164_v3  ;;  %v1190_v0 = vsel %vm1189_vm2, 1, %v2059_v10 }
 0x263   : > { %v3006_v22 = vmul.u32 %v1622_v44, %v2936_v48  ;;  %v1192_v21 = vadd.s32 %v1190_v0, %v1184_v63  ;;  %vm1193_vm4 = vc.u32 %v1191_v59, %v1187_v39  ;;  %v1340_v11 = vshll.u32 %v2867_v49, 16 }
 0x264   : > { %v3012_v56 = vmul.u32 %v1623_v2, %v2936_v48  ;;  %v1166_v6 = vshrl.u32 %v1161_v17, 16  ;;  %v1186_v7 = vshrl.u32 %v1182_v25, 16  ;;  %v1194_v62 = vsel %vm1193_vm4, 1, %v2059_v10 }
 0x265   : > { %v1196_v60 = vadd.s32 %v1194_v62, %v1192_v21  ;;  %v1342_v20 = vshll.u32 %v2870_v27, 16  ;;  %vm1344_vm8 = vc.u32 %v2854_v57, %v1340_v11  ;;  %v1346_v1 = vadd.s32 %v1340_v11, %v2854_v57 }
 0x266   : > { %v3018_v36 = vadd.s32 %v1175_v13, %v1166_v6  ;;  %v1188_v18 = vshrl.u32 %v1183_v14, 16  ;;  %vm1326_vm6 = vc.u32 %v2875_v45, %v1320_v16  ;;  %v1345_v3 = vsel %vm1344_vm8, 1, %v2059_v10 }
 0x267   : > { %v1197_v17 = vadd.s32 %v1196_v60, %v1186_v7  ;;  %v1327_v25 = vsel %vm1326_vm6, 1, %v2059_v10  ;;  %v1347_v15 = vadd.s32 %v1345_v3, %v2873_v43  ;;  %vm1348_vm7 = vc.u32 %v1346_v1, %v1342_v20 }
 0x268   : > { %v3026_v63 = vadd.s32 %v1191_v59, %v1187_v39  ;;  %v1319_v0 = vshrl.u32 %v2807_v30, 16  ;;  %v1329_v57 = vadd.s32 %v1327_v25, %v2877_v29  ;;  %v1349_v14 = vsel %vm1348_vm7, 1, %v2059_v10 }
 0x269   : > { %v3032_v13 = vmul.u32 %v1622_v44, %v2960_v4  ;;  %v1198_v16 = vadd.s32 %v1197_v17, %v1188_v18  ;;  %v1341_v45 = vshrl.u32 %v2867_v49, 16  ;;  %v1351_v21 = vadd.s32 %v1349_v14, %v1347_v15 }
 0x26a   : > { %vm1201_vm9 = vc.u32 %v3018_v36, %v3026_v63  ;;  %v1321_v43 = vshrl.u32 %v2845_v34, 16  ;;  %v1330_v39 = vadd.s32 %v1329_v57, %v1319_v0  ;;  %v1495_v59 = vshll.u32 %v2910_v54, 16 }
 0x26b   : > { %v1199_v30 = vmul.u32 %v2679_v61, %v1145_v9  ;;  %v1202_v29 = vadd.s32 1, %v1198_v16  ;;  %v1343_v11 = vshrl.u32 %v2870_v27, 16  ;;  %v1352_v6 = vadd.s32 %v1351_v21, %v1341_v45 }
 0x26c   : > { %v3041_v44 = vadd.s32 %v1330_v39, %v1321_v43  ;;  %v3043_v7 = vadd.s32 %v1346_v1, %v1342_v20  ;;  %vm1499_vm11 = vc.u32 %v2908_v53, %v1495_v59  ;;  %v1501_v49 = vadd.s32 %v1495_v59, %v2908_v53 }
 0x26d   : > { %v1203_v62 = vsel %vm1201_vm9, %v1202_v29, %v1198_v16  ;;  %v1353_v60 = vadd.s32 %v1352_v6, %v1343_v11  ;;  %v1497_v34 = vshll.u32 %v2918_v50, 16  ;;  %v1500_v18 = vsel %vm1499_vm11, 1, %v2059_v10 }
 0x26e   : > { %v1628_v61 = vshll.u32 %v3012_v56, 16  ;;  %v1204_v9 = vadd.s32 %v1203_v62, %v1199_v30  ;;  %vm1356_vm12 = vc.u32 %v3041_v44, %v3043_v7  ;;  %vm1481_vm5 = vc.u32 %v2957_v47, %v1475_v33 }
 0x26f   : > { %v1357_v27 = vadd.s32 1, %v1353_v60  ;;  %v1482_v20 = vsel %vm1481_vm5, 1, %v2059_v10  ;;  %v1502_v53 = vadd.s32 %v1500_v18, %v2929_v40  ;;  %vm1503_vm13 = vc.u32 %v1501_v49, %v1497_v34 }
 0x270   : > { %v1205_v1 = vadd.s32 536870912, %v1204_v9  ;;  %v1474_v3 = vshrl.u32 %v2887_v52, 16  ;;  %v1484_v17 = vadd.s32 %v1482_v20, %v2978_v41  ;;  %v1504_v25 = vsel %vm1503_vm13, 1, %v2059_v10 }
 0x271   : > { %v3063_v15 = vmul.u32 %v1645_v55, %v2936_v48  ;;  %v1358_v0 = vsel %vm1356_vm12, %v1357_v27, %v1353_v60  ;;  %v1496_v33 = vshrl.u32 %v2910_v54, 16  ;;  %v1506_v47 = vadd.s32 %v1504_v25, %v1502_v53 }
 0x272   : > { %v3066_v57 = vshrl.u32 %v1205_v1, 30  ;;  %v3353_v40 = vmul.u32 %v2749_v32, %v2821_v26  ;;  %v1476_v52 = vshrl.u32 %v2895_v28, 16  ;;  %v1485_v41 = vadd.s32 %v1484_v17, %v1474_v3 }
 0x273   : > { %vm1632_vm1 = vc.u32 %v3006_v22, %v1628_v61  ;;  %v1644_v16 = vand.u32 65535, %v2988_v8  ;;  %v1498_v45 = vshrl.u32 %v2918_v50, 16  ;;  %v1507_v21 = vadd.s32 %v1506_v47, %v1496_v33 }
 0x274   : > { %v1359_v14 = vadd.s32 %v1358_v0, %v3353_v40  ;;  %v1634_v43 = vadd.s32 %v1628_v61, %v3006_v22  ;;  %v1207_v54 = vshll.u32 %v3066_v57, 30  ;;  %v3077_v59 = vadd.s32 %v1485_v41, %v1476_v52 }
 0x275   : > { %v1627_v32 = vmul.u32 %v1623_v2, %v2960_v4  ;;  %v1630_v26 = vshll.u32 %v3032_v13, 16  ;;  %v3083_v28 = vadd.s32 %v1501_v49, %v1497_v34  ;;  %v1508_v30 = vadd.s32 %v1507_v21, %v1498_v45 }
 0x276   : > { %v1360_v39 = vadd.s32 536870912, %v1359_v14  ;;  %v1633_v29 = vsel %vm1632_vm1, 1, %v2059_v10  ;;  %v1208_v50 = vsub.s32 %v1204_v9, %v1207_v54  ;;  %v1650_v22 = vshll.u32 %v3063_v15, 16 }
 0x277   : > { %v1646_v6 = vmul.u32 %v1644_v16, %v2936_v48  ;;  %v3091_v62 = vmul.u32 %v1644_v16, %v2960_v4  ;;  %vm1511_vm3 = vc.u32 %v3077_v59, %v3083_v28  ;;  %v1512_v46 = vadd.s32 1, %v1508_v30 }
 0x278   : > { %v3086_v11 = vshrl.u32 %v1360_v39, 30  ;;  %vm1209_vm2 = vcmp.lt.s32.totalorder %v1208_v50, 0  ;;  %v1210_v2 = vsub.s32 0, %v1208_v50  ;;  %vm1636_vm4 = vc.u32 %v1634_v43, %v1630_v26 }
 0x279   : > { %v1607_v60 = vsel %vm1603_vm14, %v2982_v23, %v2933_v24  ;;  %v1635_v34 = vadd.s32 %v1633_v29, %v1627_v32  ;;  %v1513_v18 = vsel %vm1511_vm3, %v1512_v46, %v1508_v30  ;;  %v3354_v9 = vmul.u32 %v2824_v12, %v2862_v37 }
 0x27a   : > { %v1362_v49 = vshll.u32 %v3086_v11, 30  ;;  %v1211_v48 = vsel %vm1209_vm2, %v1210_v2, %v1208_v50  ;;  %vm1654_vm8 = vc.u32 %v1646_v6, %v1650_v22  ;;  %v1609_v20 = vsel %vm1605_vm15, %v2921_v42, %v3001_v58 }
 0x27b   : > { %v1514_v27 = vadd.s32 %v1513_v18, %v3354_v9  ;;  %v1212_v53 = vclz %v1211_v48  ;;  %v1637_v1 = vsel %vm1636_vm4, 1, %v2059_v10  ;;  %v1656_v3 = vadd.s32 %v1650_v22, %v1646_v6 }
 0x27c   : > { %v3100_v61 = vsub.s32 %v1359_v14, %v1362_v49  ;;  %v1652_v24 = vshll.u32 %v3091_v62, 16  ;;  %v1655_v12 = vsel %vm1654_vm8, 1, %v2059_v10  ;;  %v3116_v37 = vsel %vm1604_vm0, %v1607_v60, %v1609_v20 }
 0x27d   : > { %v1998_v23 = vadd.s32 4294967294, %v1212_v53  ;;  %v1515_v25 = vadd.s32 536870912, %v1514_v27  ;;  %v1649_v42 = vmul.u32 %v1645_v55, %v2960_v4  ;;  %v1639_v58 = vadd.s32 %v1637_v1, %v1635_v34 }
 0x27e   : > { %vm1364_vm14 = vcmp.lt.s32.totalorder %v3100_v61, 0  ;;  %v1365_v17 = vsub.s32 0, %v3100_v61  ;;  %vm1658_vm15 = vc.u32 %v1656_v3, %v1652_v24  ;;  %v1200_v0 = vadd.s32 %v3026_v63, %v3018_v36 }
 0x27f   : > { %vm1999_vm6 = vcmp.lt.s32.totalorder %v1998_v23, 0  ;;  %v3124_v47 = vshrl.u32 %v1515_v25, 30  ;;  %v1629_v31 = vshrl.u32 %v3012_v56, 16  ;;  %v1657_v52 = vadd.s32 %v1655_v12, %v1649_v42 }
 0x280   : > { %v1366_v33 = vsel %vm1364_vm14, %v1365_v17, %v3100_v61  ;;  %v1215_v40 = vsel %vm1999_vm6, 0, %v1998_v23  ;;  %v1659_v4 = vsel %vm1658_vm15, 1, %v2059_v10  ;;  %v1355_v55 = vadd.s32 %v3043_v7, %v3041_v44 }
 0x281   : > { %v1367_v14 = vclz %v1366_v33  ;;  %v1216_v41 = vsub.s32 32, %v1215_v40  ;;  %v1220_v16 = vsub.s32 4294967266, %v1215_v40  ;;  %v1517_v8 = vshll.u32 %v3124_v47, 30 }
 0x282   : > { %v1631_v63 = vshrl.u32 %v3032_v13, 16  ;;  %v1640_v45 = vadd.s32 %v1639_v58, %v1629_v31  ;;  %v1217_v21 = vshll.u32 %v1208_v50, %v1215_v40  ;;  %v1230_v56 = vsub.s32 4, %v3066_v57 }
 0x283   : > { %v2001_v36 = vadd.s32 4294967294, %v1367_v14  ;;  %v1218_v43 = vshrl.u32 %v1200_v0, %v1216_v41  ;;  %v1221_v54 = vadd.s32 127, %v1220_v16  ;;  %v3132_v39 = vsub.s32 %v1514_v27, %v1517_v8 }
 0x284   : > { %v1651_v32 = vshrl.u32 %v3063_v15, 16  ;;  %v1661_v26 = vadd.s32 %v1659_v4, %v1657_v52  ;;  %v1653_v50 = vshrl.u32 %v3091_v62, 16  ;;  %v3139_v6 = vadd.s32 %v1640_v45, %v1631_v63 }
 0x285   : > { %vm2002_vm0 = vcmp.lt.s32.totalorder %v2001_v36, 0  ;;  %v1219_v30 = vor.u32 %v1218_v43, %v1217_v21  ;;  %v1222_v10 = vshll.u32 %v1221_v54, 23  ;;  %vm1519_vm7 = vcmp.lt.s32.totalorder %v3132_v39, 0 }
 0x286   : > { %v1370_v29 = vsel %vm2002_vm0, 0, %v2001_v36  ;;  %v1520_v13 = vsub.s32 0, %v3132_v39  ;;  %v3141_v46 = vadd.s32 %v1656_v3, %v1652_v24  ;;  %v1662_v2 = vadd.s32 %v1661_v26, %v1651_v32 }
 0x287   : > { %v1371_v44 = vsub.s32 32, %v1370_v29  ;;  %v1375_v7 = vsub.s32 4294967266, %v1370_v29  ;;  %v1223_v22 = vor.u32 4788187, %v1222_v10  ;;  %v1372_v15 = vshll.u32 %v3100_v61, %v1370_v29 }
 0x288   : > { %v1521_v34 = vsel %vm1519_vm7, %v1520_v13, %v3132_v39  ;;  %v1226_v48 = vcvt.s32.f32 %v1219_v30  ;;  %v1663_v27 = vadd.s32 %v1662_v2, %v1653_v50  ;;  %vm1108_vm9 = vcmp.lt.s32.totalorder %v2670_v38, 0 }
 0x289   : > { %v1373_v49 = vshrl.u32 %v1355_v55, %v1371_v44  ;;  %v1376_v60 = vadd.s32 127, %v1375_v7  ;;  %v1224_v18 = vand.u32 2147483647, %v1223_v22  ;;  %v1522_v9 = vclz %v1521_v34 }
 0x28a   : > { %vm1666_vm11 = vc.u32 %v3139_v6, %v3141_v46  ;;  %v1667_v3 = vadd.s32 1, %v1663_v27  ;;  %v1664_v61 = vmul.u32 %v2885_v19, %v3116_v37  ;;  %v3355_v24 = vand.u32 2147483647, %v2670_v38 }
 0x28b   : > { %v1374_v20 = vor.u32 %v1373_v49, %v1372_v15  ;;  %v1377_v62 = vshll.u32 %v1376_v60, 23  ;;  %v1227_v53 = vmul.f32 %v1226_v48, %v1224_v18  ;;  %v2004_v1 = vadd.s32 4294967294, %v1522_v9 }
 0x28c   : > { %vm3152_vm12 = vcmp.le.f32.partialorder %v3355_v24, 0.7853982  ;;  %v1231_v17 = vsel %vm1108_vm9, %v1230_v56, %v3066_v57  ;;  %v1385_v42 = vsub.s32 4, %v3086_v11  ;;  %v1510_v58 = vadd.s32 %v3083_v28, %v3077_v59 }
 0x28d   : > { %v1378_v25 = vor.u32 4788187, %v1377_v62  ;;  %v1228_v12 = vxor.u32 2147483648, %v1227_v53  ;;  %vm2005_vm5 = vcmp.lt.s32.totalorder %v2004_v1, 0  ;;  %v1381_v19 = vcvt.s32.f32 %v1374_v20 }
 0x28e   : > { %v1525_v37 = vsel %vm2005_vm5, 0, %v2004_v1  ;;  %v1668_v33 = vsel %vm1666_vm11, %v1667_v3, %v1663_v27  ;;  %v1233_v14 = vsel %vm3152_vm12, 0, %v1231_v17  ;;  %vm1263_vm13 = vcmp.lt.s32.totalorder %v2674_v51, 0 }
 0x28f   : > { %v1379_v0 = vand.u32 2147483647, %v1378_v25  ;;  %v1229_v40 = vsel %vm1108_vm9, %v1228_v12, %v1227_v53  ;;  %v1526_v31 = vsub.s32 32, %v1525_v37  ;;  %v1530_v57 = vsub.s32 4294967266, %v1525_v37 }
 0x290   : > { %v3170_v52 = vsel %vm3152_vm12, %v2670_v38, %v1229_v40  ;;  %v1669_v28 = vadd.s32 %v1668_v33, %v1664_v61  ;;  %v1527_v16 = vshll.u32 %v3132_v39, %v1525_v37  ;;  %v1250_v55 = vadd.s32 3, %v1233_v14 }
 0x291   : > { %v1382_v59 = vmul.f32 %v1381_v19, %v1379_v0  ;;  %v1234_v41 = vmul.f32 %v3170_v52, %v3170_v52  ;;  %v1528_v8 = vshrl.u32 %v1510_v58, %v1526_v31  ;;  %v1531_v4 = vadd.s32 127, %v1530_v57 }
 0x292   : > { %v1386_v63 = vsel %vm1263_vm13, %v1385_v42, %v3086_v11  ;;  %v1670_v45 = vadd.s32 536870912, %v1669_v28  ;;  %vm1418_vm1 = vcmp.lt.s32.totalorder %v2684_v5, 0  ;;  %v3358_v32 = vand.u32 2147483647, %v2674_v51 }
 0x293   : > { %v1383_v36 = vxor.u32 2147483648, %v1382_v59  ;;  %v1235_v21 = vmul.f32 -0.001358992, %v1234_v41  ;;  %v1242_v43 = vmul.f32 -0.00019511016, %v1234_v41  ;;  %v1529_v54 = vor.u32 %v1528_v8, %v1527_v16 }
 0x294   : > { %v1532_v56 = vshll.u32 %v1531_v4, 23  ;;  %vm3181_vm3 = vcmp.le.f32.partialorder %v3358_v32, 0.7853982  ;;  %v3187_v30 = vshrl.u32 %v1670_v45, 30  ;;  %v1251_v7 = vand.u32 3, %v1250_v55 }
 0x295   : > { %v1384_v39 = vsel %vm1263_vm13, %v1383_v36, %v1382_v59  ;;  %v1236_v10 = vadd.f32 0.041655596, %v1235_v21  ;;  %v1243_v11 = vadd.f32 0.008332121, %v1242_v43  ;;  %v1388_v13 = vsel %vm3181_vm3, 0, %v1386_v63 }
 0x296   : > { %v3192_v29 = vsel %vm3181_vm3, %v2674_v51, %v1384_v39  ;;  %v1533_v44 = vor.u32 4788187, %v1532_v56  ;;  %v1672_v22 = vshll.u32 %v3187_v30, 30  ;;  %v1536_v60 = vcvt.s32.f32 %v1529_v54 }
 0x297   : > { %v1389_v50 = vmul.f32 %v3192_v29, %v3192_v29  ;;  %v1237_v2 = vmul.f32 %v1236_v10, %v1234_v41  ;;  %v1244_v15 = vmul.f32 %v1243_v11, %v1234_v41  ;;  %v1540_v48 = vsub.s32 4, %v3124_v47 }
 0x298   : > { %v1534_v49 = vand.u32 2147483647, %v1533_v44  ;;  %v3200_v9 = vsub.s32 %v1669_v28, %v1672_v22  ;;  %v3361_v62 = vand.u32 2147483647, %v2684_v5  ;;  %vm1253_vm4 = vcmp.eq.s32.totalorder %v1251_v7, 0 }
 0x299   : > { %v1390_v34 = vmul.f32 -0.001358992, %v1389_v50  ;;  %v1397_v18 = vmul.f32 -0.00019511016, %v1389_v50  ;;  %v1238_v27 = vadd.f32 -0.4999988, %v1237_v2  ;;  %vm1249_vm15 = vweird.f32 %v2670_v38 }
 0x29a   : > { %v1245_v20 = vadd.f32 -0.16666654, %v1244_v15  ;;  %vm3204_vm2 = vcmp.le.f32.partialorder %v3361_v62, 0.7853982  ;;  %v1537_v1 = vmul.f32 %v1536_v60, %v1534_v49  ;;  %vm1674_vm8 = vcmp.lt.s32.totalorder %v3200_v9, 0 }
 0x29b   : > { %v1391_v3 = vadd.f32 0.041655596, %v1390_v34  ;;  %v1398_v61 = vadd.f32 0.008332121, %v1397_v18  ;;  %v1675_v24 = vsub.s32 0, %v3200_v9  ;;  %v1239_v23 = vmul.f32 %v1238_v27, %v1234_v41 }
 0x29c   : > { %v1246_v17 = vmul.f32 %v1245_v20, %v1234_v41  ;;  %vm1252_vm14 = vcmp.lt.s32.totalorder %v1251_v7, 2  ;;  %v1405_v25 = vadd.s32 3, %v1388_v13  ;;  %v1538_v12 = vxor.u32 2147483648, %v1537_v1 }
 0x29d   : > { %v1392_v42 = vmul.f32 %v1391_v3, %v1389_v50  ;;  %v1399_v58 = vmul.f32 %v1398_v61, %v1389_v50  ;;  %v1541_v0 = vsel %vm1418_vm1, %v1540_v48, %v3124_v47  ;;  %v1676_v19 = vsel %vm1674_vm8, %v1675_v24, %v3200_v9 }
 0x29e   : > { %v1240_v37 = vadd.f32 1.0, %v1239_v23  ;;  %v1247_v33 = vadd.f32 1.0, %v1246_v17  ;;  %v1539_v40 = vsel %vm1418_vm1, %v1538_v12, %v1537_v1  ;;  %v1677_v14 = vclz %v1676_v19  ;;  %v1729_v23 = vld [vmem:[%s3328_s5 + $0x18] sm:$0xff] }
 0x29f   : > { %vm1256_vm6 = vcmp.eq.s32.totalorder %v1251_v7, 2  ;;  %v1393_v31 = vadd.f32 -0.4999988, %v1392_v42  ;;  %v1400_v57 = vadd.f32 -0.16666654, %v1399_v58  ;;  %v1542_v59 = vsel %vm3204_vm2, %v2684_v5, %v1539_v40  ;;  %1826 = vmatpush.msra.mxu2 %v1729_v23  ;;  %2027 = vmatpush.msra.mxu3 %v1729_v23 }
 0x2a0   : > { %v1248_v28 = vmul.f32 %v1247_v33, %v3170_v52  ;;  %v1257_v41 = vxor.u32 2147483648, %v1240_v37  ;;  %v1544_v16 = vmul.f32 %v1542_v59, %v1542_v59  ;;  %v2007_v47 = vadd.s32 4294967294, %v1677_v14 }
 0x2a1   : > { %v1394_v8 = vmul.f32 %v1393_v31, %v1389_v50  ;;  %v1401_v4 = vmul.f32 %v1400_v57, %v1389_v50  ;;  %v1406_v55 = vand.u32 3, %v1405_v25  ;;  %v1543_v36 = vsel %vm3204_vm2, 0, %v1541_v0 }
 0x2a2   : > { %v1254_v63 = vxor.u32 2147483648, %v1248_v28  ;;  %v1545_v45 = vmul.f32 -0.001358992, %v1544_v16  ;;  %v1552_v21 = vmul.f32 -0.00019511016, %v1544_v16  ;;  %v1665_v43 = vadd.s32 %v3141_v46, %v3139_v6 }
 0x2a3   : > { %v1258_v54 = vsel %vm1256_vm6, %v1257_v41, %v1248_v28  ;;  %v1395_v56 = vadd.f32 1.0, %v1394_v8  ;;  %v1402_v32 = vadd.f32 1.0, %v1401_v4  ;;  %vm2008_vm0 = vcmp.lt.s32.totalorder %v2007_v47, 0 }
 0x2a4   : > { %v1255_v52 = vsel %vm1253_vm4, %v1240_v37, %v1254_v63  ;;  %v1546_v26 = vadd.f32 0.041655596, %v1545_v45  ;;  %v1553_v39 = vadd.f32 0.008332121, %v1552_v21  ;;  %v1680_v10 = vsel %vm2008_vm0, 0, %v2007_v47  ;;  %v1726_v37 = vld [vmem:[%s3328_s5] sm:$0xff] }
 0x2a5   : > { %v1259_v11 = vsel %vm1252_vm14, %v1255_v52, %v1258_v54  ;;  %v1403_v44 = vmul.f32 %v1402_v32, %v3192_v29  ;;  %v1412_v13 = vxor.u32 2147483648, %v1395_v56  ;;  %v1681_v50 = vsub.s32 32, %v1680_v10 }
 0x2a6   : > { %v1260_v22 = vsel %vm1249_vm15, nan, %v1259_v11  ;;  %vm1407_vm7 = vcmp.lt.s32.totalorder %v1406_v55, 2  ;;  %v1547_v6 = vmul.f32 %v1546_v26, %v1544_v16  ;;  %v1554_v46 = vmul.f32 %v1553_v39, %v1544_v16 }
 0x2a7   : > { %1734 = vxpose.xlu2.b32.start [1/4] (short) %v1260_v22, 128  ;;  %vm1408_vm9 = vcmp.eq.s32.totalorder %v1406_v55, 0  ;;  %v1409_v2 = vxor.u32 2147483648, %v1403_v44  ;;  %v1683_v15 = vshrl.u32 %v1665_v43, %v1681_v50  ;;  %v1685_v49 = vsub.s32 4294967266, %v1680_v10 }
 0x2a8   : > { %vm1411_vm11 = vcmp.eq.s32.totalorder %v1406_v55, 2  ;;  %v1548_v60 = vadd.f32 -0.4999988, %v1547_v6  ;;  %v1555_v34 = vadd.f32 -0.16666654, %v1554_v46  ;;  %v1560_v7 = vadd.s32 3, %v1543_v36 }
 0x2a9   : > { %v1410_v18 = vsel %vm1408_vm9, %v1395_v56, %v1409_v2  ;;  %v1413_v48 = vsel %vm1411_vm11, %v1412_v13, %v1403_v44  ;;  %v1682_v29 = vshll.u32 %v3200_v9, %v1680_v10  ;;  %v1686_v27 = vadd.s32 127, %v1685_v49  ;;  %v1728_v9 = vld [vmem:[%s3328_s5 + $0x10] sm:$0xff] }
 0x2aa   : > { %v1414_v38 = vsel %vm1407_vm7, %v1410_v18, %v1413_v48  ;;  %v1549_v20 = vmul.f32 %v1548_v60, %v1544_v16  ;;  %v1556_v62 = vmul.f32 %v1555_v34, %v1544_v16  ;;  %vm1404_vm12 = vweird.f32 %v2674_v51  ;;  %v1727_v51 = vld [vmem:[%s3328_s5 + $0x8] sm:$0xff]  ;;  %1827 = vmatpush.msra.mxu2 %v1728_v9  ;;  %2028 = vmatpush.msra.mxu3 %v1728_v9 }
 0x2ab   : > { %v1684_v53 = vor.u32 %v1683_v15, %v1682_v29  ;;  %v1687_v1 = vshll.u32 %v1686_v27, 23  ;;  %v1415_v3 = vsel %vm1404_vm12, nan, %v1414_v38  ;;  %v1561_v17 = vand.u32 3, %v1560_v7 }
 0x2ac   : > { %v1550_v61 = vadd.f32 1.0, %v1549_v20  ;;  %v1557_v24 = vadd.f32 1.0, %v1556_v62  ;;  %1828 = vmatpush.msra.mxu2 %v1727_v51  ;;  %2029 = vmatpush.msra.mxu3 %v1727_v51  ;;  %vm1559_vm3 = vweird.f32 %v2684_v5  ;;  %vm1573_vm2 = vcmp.lt.s32.totalorder %v2767_v35, 0 }
 0x2ad   : > { %v1688_v25 = vor.u32 4788187, %v1687_v1  ;;  %v1691_v0 = vcvt.s32.f32 %v1684_v53  ;;  %vm1563_vm5 = vcmp.eq.s32.totalorder %v1561_v17, 0  ;;  %vm1566_vm13 = vcmp.eq.s32.totalorder %v1561_v17, 2 }
 0x2ae   : > { %v1558_v12 = vmul.f32 %v1557_v24, %v1542_v59  ;;  %v1567_v42 = vxor.u32 2147483648, %v1550_v61  ;;  %vm1562_vm1 = vcmp.lt.s32.totalorder %v1561_v17, 2  ;;  %1829 = vmatpush.msra.mxu2 %v1726_v37  ;;  %2030 = vmatpush.msra.mxu3 %v1726_v37  ;;  %v3364_v28 = vand.u32 2147483647, %v2767_v35 }
 0x2af   : > { %1735 = vxpose.xlu2.b32.cont [2/4] (short) %v1415_v3, 128  ;;  %v1689_v58 = vand.u32 2147483647, %v1688_v25  ;;  %v1695_v47 = vsub.s32 4, %v3187_v30  ;;  %vm1714_vm6 = vweird.f32 %v2767_v35  ;;  %vm1879_vm0 = vcmask 130048  }
 0x2b0   : > { %v1564_v19 = vxor.u32 2147483648, %v1558_v12  ;;  %v1568_v14 = vsel %vm1566_vm13, %v1567_v42, %v1558_v12  ;;  %vm3250_vm4 = vcmp.le.f32.partialorder %v3364_v28, 0.7853982 }
 0x2b1   : > { %v1692_v33 = vmul.f32 %v1691_v0, %v1689_v58  ;;  %v1696_v36 = vsel %vm1573_vm2, %v1695_v47, %v3187_v30 }
 0x2b2   : > { %v1565_v40 = vsel %vm1563_vm5, %v1550_v61, %v1564_v19  ;;  %v1698_v21 = vsel %vm3250_vm4, 0, %v1696_v36  ;;  %v2050_v61 = vld [vmem:[%s3329_s6] ss:$0 sm:$0xff] }
 0x2b3   : > { %v1569_v31 = vsel %vm1562_vm1, %v1565_v40, %v1568_v14  ;;  %v1693_v57 = vxor.u32 2147483648, %v1692_v33  ;;  %v1715_v52 = vadd.s32 3, %v1698_v21 }
 0x2b4   : > { %v1570_v59 = vsel %vm1559_vm3, nan, %v1569_v31 }
 0x2b5   : > { %v1694_v16 = vsel %vm1573_vm2, %v1693_v57, %v1692_v33  ;;  %v1716_v44 = vand.u32 3, %v1715_v52 }
 0x2b6   : > { %v1697_v5 = vsel %vm3250_vm4, %v2767_v35, %v1694_v16 }
 0x2b7   : > { %1736 = vxpose.xlu2.b32.cont [3/4] (short) %v1570_v59, 128  ;;  %v1699_v8 = vmul.f32 %v1697_v5, %v1697_v5  ;;  %vm1718_vm8 = vcmp.eq.s32.totalorder %v1716_v44, 0  ;;  %vm1721_vm14 = vcmp.eq.s32.totalorder %v1716_v44, 2  ;;  %vm1717_vm15 = vcmp.lt.s32.totalorder %v1716_v44, 2 }
 0x2b9   : > { %v1700_v4 = vmul.f32 -0.001358992, %v1699_v8  ;;  %v1707_v55 = vmul.f32 -0.00019511016, %v1699_v8 }
 0x2bb   : > { %v1701_v63 = vadd.f32 0.041655596, %v1700_v4  ;;  %v1708_v45 = vadd.f32 0.008332121, %v1707_v55 }
 0x2bd   : > { %v1702_v43 = vmul.f32 %v1701_v63, %v1699_v8  ;;  %v1709_v54 = vmul.f32 %v1708_v45, %v1699_v8 }
 0x2bf   : > { %v1703_v56 = vadd.f32 -0.4999988, %v1702_v43  ;;  %v1710_v32 = vadd.f32 -0.16666654, %v1709_v54 }
 0x2c1   : > { %v1704_v26 = vmul.f32 %v1703_v56, %v1699_v8  ;;  %v1711_v39 = vmul.f32 %v1710_v32, %v1699_v8 }
 0x2c3   : > { %v1705_v10 = vadd.f32 1.0, %v1704_v26  ;;  %v1712_v11 = vadd.f32 1.0, %v1711_v39 }
 0x2c5   : > { %v1713_v13 = vmul.f32 %v1712_v11, %v1697_v5  ;;  %v1722_v50 = vxor.u32 2147483648, %v1705_v10 }
 0x2c7   : > { %v1719_v22 = vxor.u32 2147483648, %v1713_v13  ;;  %v1723_v6 = vsel %vm1721_vm14, %v1722_v50, %v1713_v13 }
 0x2c9   : > { %v1720_v30 = vsel %vm1718_vm8, %v1705_v10, %v1719_v22 }
 0x2ca   : > { %v1724_v46 = vsel %vm1717_vm15, %v1720_v30, %v1723_v6 }
 0x2cb   : > { %v1725_v2 = vsel %vm1714_vm6, nan, %v1724_v46 }
 0x2cc   : > { %1737 = vxpose.xlu2.b32.end [4/4] (short) %v1725_v2, 128 }
 0x34d   : > { %v1750_v15 = vpop.trf.xlu2 }
 0x34e   : > { %2009 = vmatmul.msk.f32.vlgmr.msra.gmra.mxu2 %vm1064_vm10, %v1750_v15 }
 0x355   : > { %v1751_v49 = vpop.trf.xlu2 }
 0x356   : > { %2010 = vmatmul.msk.f32.gmra.mxu2 %vm1064_vm10, %v1751_v49 }
 0x35d   : > { %v1752_v60 = vpop.trf.xlu2 }
 0x35e   : > { %2011 = vmatmul.msk.f32.gmra.mxu2 %vm1064_vm10, %v1752_v60 }
 0x365   : > { %v1753_v34 = vpop.trf.xlu2 }
 0x366   : > { %2012 = vmatmul.msk.f32.gmra.mxu2 %vm1064_vm10, %v1753_v34 }
 0x36d   : > { %v1754_v7 = vpop.trf.xlu2 }
 0x36e   : > { %2013 = vmatmul.msk.f32.gmra.mxu2 %vm1064_vm10, %v1754_v7 }
 0x375   : > { %v1755_v18 = vpop.trf.xlu2 }
 0x376   : > { %2014 = vmatmul.msk.f32.gmra.mxu2 %vm1064_vm10, %v1755_v18 }
 0x37d   : > { %v1756_v35 = vpop.trf.xlu2 }
 0x37e   : > { %2015 = vmatmul.msk.f32.gmra.mxu2 %vm1064_vm10, %v1756_v35 }
 0x385   : > { %v1757_v48 = vpop.trf.xlu2 }
 0x386   : > { %2016 = vmatmul.msk.f32.gmra.mxu2 %vm1064_vm10, %v1757_v48 }
 0x38d   : > { %v1758_v29 = vpop.trf.xlu2 }
 0x38e   : > { %2017 = vmatmul.msk.f32.vlgmr.msra.gmra.mxu3 %vm1064_vm10, %v1758_v29 }
 0x395   : > { %v1759_v27 = vpop.trf.xlu2 }
 0x396   : > { %2018 = vmatmul.msk.f32.gmra.mxu3 %vm1064_vm10, %v1759_v27 }
 0x39d   : > { %v1760_v38 = vpop.trf.xlu2 }
 0x39e   : > { %2019 = vmatmul.msk.f32.gmra.mxu3 %vm1064_vm10, %v1760_v38 }
 0x3a5   : > { %v1761_v20 = vpop.trf.xlu2 }
 0x3a6   : > { %2020 = vmatmul.msk.f32.gmra.mxu3 %vm1064_vm10, %v1761_v20 }
 0x3ad   : > { %v1762_v62 = vpop.trf.xlu2 }
 0x3ae   : > { %2021 = vmatmul.msk.f32.gmra.mxu3 %vm1064_vm10, %v1762_v62 }
 0x3b5   : > { %v1763_v53 = vpop.trf.xlu2 }
 0x3b6   : > { %2022 = vmatmul.msk.f32.gmra.mxu3 %vm1064_vm10, %v1763_v53 }
 0x3bd   : > { %v1764_v1 = vpop.trf.xlu2 }
 0x3be   : > { %2023 = vmatmul.msk.f32.gmra.mxu3 %vm1064_vm10, %v1764_v1 }
 0x3c5   : > { %v1765_v3 = vpop.trf.xlu2 }
 0x3c6   : > { %2024 = vmatmul.msk.f32.gmra.mxu3 %vm1064_vm10, %v1765_v3 }
 0x3d1   : > { %v1831_v24 = vpop.f32.mrf.mxu2 }
 0x3d2   : > { %v1832_v23 = vadd.f32 %v2050_v61, %v1831_v24 }
 0x3d4   : > { %1880 = vst.msk [vmem:[%s3286_s12] sm:$0xff] %vm1879_vm0, %v1832_v23 }
 0x3d9   : > { %v1834_v9 = vpop.f32.mrf.mxu2 }
 0x3da   : > { %v1835_v17 = vadd.f32 %v2050_v61, %v1834_v9 }
 0x3dc   : > { %1881 = vst.msk [vmem:[%s3286_s12 + $0x8] sm:$0xff] %vm1879_vm0, %v1835_v17 }
 0x3e1   : > { %v1837_v25 = vpop.f32.mrf.mxu2 }
 0x3e2   : > { %v1838_v12 = vadd.f32 %v2050_v61, %v1837_v25 }
 0x3e4   : > { %1882 = vst.msk [vmem:[%s3286_s12 + $0x10] sm:$0xff] %vm1879_vm0, %v1838_v12 }
 0x3e9   : > { %v1840_v42 = vpop.f32.mrf.mxu2 }
 0x3ea   : > { %v1841_v51 = vadd.f32 %v2050_v61, %v1840_v42 }
 0x3ec   : > { %1883 = vst.msk [vmem:[%s3286_s12 + $0x18] sm:$0xff] %vm1879_vm0, %v1841_v51 }
 0x3f1   : > { %v1843_v58 = vpop.f32.mrf.mxu2 }
 0x3f2   : > { %v1844_v0 = vadd.f32 %v2050_v61, %v1843_v58 }
 0x3f4   : > { %1884 = vst.msk [vmem:[%s3286_s12 + $0x20] sm:$0xff] %vm1879_vm0, %v1844_v0 }
 0x3f9   : > { %v1846_v19 = vpop.f32.mrf.mxu2 }
 0x3fa   : > { %v1847_v37 = vadd.f32 %v2050_v61, %v1846_v19 }
 0x3fc   : > { %1885 = vst.msk [vmem:[%s3286_s12 + $0x28] sm:$0xff] %vm1879_vm0, %v1847_v37 }
 0x401   : > { %v1849_v33 = vpop.f32.mrf.mxu2 }
 0x402   : > { %v1850_v40 = vadd.f32 %v2050_v61, %v1849_v33 }
 0x404   : > { %1886 = vst.msk [vmem:[%s3286_s12 + $0x30] sm:$0xff] %vm1879_vm0, %v1850_v40 }
 0x409   : > { %v1852_v14 = vpop.f32.mrf.mxu2 }
 0x40a   : > { %v1853_v31 = vadd.f32 %v2050_v61, %v1852_v14 }
 0x40c   : > { %1887 = vst.msk [vmem:[%s3286_s12 + $0x38] sm:$0xff] %vm1879_vm0, %v1853_v31 }
 0x411   : > { %v1855_v57 = vpop.f32.mrf.mxu3 }
 0x412   : > { %v1856_v59 = vadd.f32 %v2050_v61, %v1855_v57 }
 0x414   : > { %1888 = vst.msk [vmem:[%s3286_s12 + $0x40] sm:$0xff] %vm1879_vm0, %v1856_v59 }
 0x419   : > { %v1858_v28 = vpop.f32.mrf.mxu3 }
 0x41a   : > { %v1859_v41 = vadd.f32 %v2050_v61, %v1858_v28 }
 0x41c   : > { %1889 = vst.msk [vmem:[%s3286_s12 + $0x48] sm:$0xff] %vm1879_vm0, %v1859_v41 }
 0x421   : > { %v1861_v16 = vpop.f32.mrf.mxu3 }
 0x422   : > { %v1862_v47 = vadd.f32 %v2050_v61, %v1861_v16 }
 0x424   : > { %1890 = vst.msk [vmem:[%s3286_s12 + $0x50] sm:$0xff] %vm1879_vm0, %v1862_v47 }
 0x429   : > { %v1864_v5 = vpop.f32.mrf.mxu3 }
 0x42a   : > { %v1865_v8 = vadd.f32 %v2050_v61, %v1864_v5 }
 0x42c   : > { %1891 = vst.msk [vmem:[%s3286_s12 + $0x58] sm:$0xff] %vm1879_vm0, %v1865_v8 }
 0x431   : > { %v1867_v4 = vpop.f32.mrf.mxu3 }
 0x432   : > { %v1868_v55 = vadd.f32 %v2050_v61, %v1867_v4 }
 0x434   : > { %1892 = vst.msk [vmem:[%s3286_s12 + $0x60] sm:$0xff] %vm1879_vm0, %v1868_v55 }
 0x439   : > { %v1870_v36 = vpop.f32.mrf.mxu3 }
 0x43a   : > { %v1871_v63 = vadd.f32 %v2050_v61, %v1870_v36 }
 0x43c   : > { %1893 = vst.msk [vmem:[%s3286_s12 + $0x68] sm:$0xff] %vm1879_vm0, %v1871_v63 }
 0x441   : > { %v1873_v45 = vpop.f32.mrf.mxu3 }
 0x442   : > { %v1874_v21 = vadd.f32 %v2050_v61, %v1873_v45 }
 0x444   : > { %1894 = vst.msk [vmem:[%s3286_s12 + $0x70] sm:$0xff] %vm1879_vm0, %v1874_v21 }
 0x449   : > { %v1876_v43 = vpop.f32.mrf.mxu3 }
 0x44a   : > { %v1877_v54 = vadd.f32 %v2050_v61, %v1876_v43 }
 0x44c   : > { %1895 = vst.msk [vmem:[%s3286_s12 + $0x78] sm:$0xff] %vm1879_vm0, %v1877_v54 }
 0x44d PF: > { %s17_s24 = sadd.s32 1, %s2057_s24  }
 0x44e   : > { %p14_p4 = scmp.ge.s32.totalorder %s17_s24, 5  }
 0x450   :  { %16 = sbr.rel (!%p14_p4) target bundleno = 1 (0x1), region = 78 }

</bundles_post_ra>
